<compile_context>
chip_gen: v7x
topology: tpu7x:2x2x1
jax: 0.10.0
libtpu: 0.0.40
codegen_flags: <defaults>
</compile_context>

<pallas_src>
import functools

import jax
import jax.numpy as jnp
from jax import lax
from jax.experimental import pallas as pl
from jax.experimental.pallas import tpu as pltpu


def _round_up(x, m):
    return ((x + m - 1) // m) * m


def _gru_policy_kernel(
    x_ref,                 # (S*Bp, F_in)
    w1_ref, b1_ref,        # (F_in, H), (1, H)
    w_ih_ref, w_hh_ref,    # (H, 3H) each, gate order [r | z | n]
    b_rz_ref,              # (1, 2H)  = b_ih[:2H] + b_hh[:2H]  (pre-summed)
    b_in_ref, b_hn_ref,    # (1, H) each (must stay separate: r * (W_hn h + b_hn))
    w2_ref, b2_ref,        # (H, Op), (1, Op)  (Op = out_features padded to 128)
    y_ref,                 # (S*Bp, Op)  log-probs (lane-dense store)
    h_ref,                 # (Bp, H)     final hidden state
    *, seq_len, batch,
):
    H = w1_ref.shape[1]

    # fc_in + ReLU hoisted over all timesteps: one MXU matmul, full sublane fill.
    x = x_ref[...]
    a = jnp.maximum(
        jnp.dot(x, w1_ref[...], preferred_element_type=jnp.float32) + b1_ref[...],
        0.0,
    )  # (S*Bp, H)

    w_ih = w_ih_ref[...]
    w_hh = w_hh_ref[...]
    b_rz = b_rz_ref[...]
    b_in = b_in_ref[...]
    b_hn = b_hn_ref[...]

    # Time recurrence: statically unrolled, h carried in vregs (no scratch).
    h = jnp.zeros((batch, H), jnp.float32)
    hs = []
    for t in range(seq_len):
        a_t = a[t * batch:(t + 1) * batch, :]                 # static, sublane-aligned
        gi = jnp.dot(a_t, w_ih, preferred_element_type=jnp.float32)   # (Bp, 3H)
        gh = jnp.dot(h, w_hh, preferred_element_type=jnp.float32)     # (Bp, 3H)
        rz = jax.nn.sigmoid(gi[:, :2 * H] + gh[:, :2 * H] + b_rz)
        r = rz[:, :H]
        z = rz[:, H:]
        n = jnp.tanh(gi[:, 2 * H:] + b_in + r * (gh[:, 2 * H:] + b_hn))
        h = (1.0 - z) * n + z * h
        hs.append(h)

    h_all = jnp.concatenate(hs, axis=0)                       # (S*Bp, H)

    # fc_out: ReLU -> Linear -> LogSoftmax, hoisted: one matmul, one reduction,
    # one lane-dense (Op multiple of 128) store.
    o = jnp.maximum(h_all, 0.0)
    logits = jnp.dot(o, w2_ref[...], preferred_element_type=jnp.float32) + b2_ref[...]
    m = jnp.max(logits, axis=-1, keepdims=True)
    lse = jnp.log(jnp.sum(jnp.exp(logits - m), axis=-1, keepdims=True)) + m
    y_ref[...] = (logits - lse).astype(y_ref.dtype)
    h_ref[...] = h.astype(h_ref.dtype)


def _full_spec(shape):
    nd = len(shape)
    return pl.BlockSpec(tuple(shape), lambda i, _nd=nd: (0,) * _nd)


def gru_policy_forward(x, params):
    """x: (seq_len, batch, in_features) f32. Returns (log_probs, h)."""
    S, B, F = x.shape
    H = params["w1"].shape[1]
    O = params["w2"].shape[1]

    Bp = _round_up(B, 8)      # sublane-align the batch working set
    Op = _round_up(O, 128)    # lane-dense output store

    # Pad batch (zeros) and flatten to 2D so the kernel only does 2D matmuls.
    xp = x if Bp == B else jnp.pad(x, ((0, 0), (0, Bp - B), (0, 0)))
    x2 = xp.reshape(S * Bp, F).astype(jnp.float32)

    # Pre-sum the r/z biases; keep n biases separate (r gates b_hn).
    b_ih, b_hh = params["b_ih"], params["b_hh"]
    b_rz = (b_ih[: 2 * H] + b_hh[: 2 * H]).reshape(1, 2 * H)
    b_in = b_ih[2 * H:].reshape(1, H)
    b_hn = b_hh[2 * H:].reshape(1, H)

    # Pad fc_out to Op lanes: zero weights, -1e30 bias so padded logits vanish.
    w2 = params["w2"]
    b2 = params["b2"].reshape(1, O)
    if Op != O:
        w2 = jnp.pad(w2, ((0, 0), (0, Op - O)))
        b2 = jnp.concatenate(
            [b2, jnp.full((1, Op - O), jnp.float32(-1e30))], axis=1)

    weight_args = [
        params["w1"], params["b1"].reshape(1, H),
        params["w_ih"], params["w_hh"],
        b_rz, b_in, b_hn,
        w2, b2,
    ]

    in_specs = [_full_spec(x2.shape)] + [_full_spec(a.shape) for a in weight_args]
    out_specs = [_full_spec((S * Bp, Op)), _full_spec((Bp, H))]
    out_shape = [
        jax.ShapeDtypeStruct((S * Bp, Op), jnp.float32),
        jax.ShapeDtypeStruct((Bp, H), jnp.float32),
    ]

    grid_spec = pltpu.PrefetchScalarGridSpec(
        num_scalar_prefetch=0,
        grid=(1,),                       # single step: whole recurrence in-kernel
        in_specs=in_specs,
        out_specs=out_specs,
    )

    y2, h2 = pl.pallas_call(
        functools.partial(_gru_policy_kernel, seq_len=S, batch=Bp),
        out_shape=out_shape,
        grid_spec=grid_spec,
        compiler_params=pltpu.CompilerParams(
            dimension_semantics=("arbitrary",),
        ),
    )(x2, *weight_args)

    y = y2.reshape(S, Bp, Op)[:, :B, :O]
    h = h2[None, :B, :]
    return y, h


def init_params(key, in_features, hidden, out_features):
    """Deterministic parameter init mirroring the module's __init__ shapes."""
    ks = jax.random.split(key, 6)
    ortho = jax.nn.initializers.orthogonal()
    k = 1.0 / jnp.sqrt(hidden)  # PyTorch nn.GRU default uniform bound

    # fc_in: orthogonal weight, zero bias (stored as (in, out))
    w1 = ortho(ks[0], (in_features, hidden), jnp.float32)
    b1 = jnp.zeros((hidden,), jnp.float32)

    # GRU: uniform(-k, k), concatenated gate order r, z, n (stored as (in, 3*out))
    w_ih = jax.random.uniform(ks[1], (hidden, 3 * hidden), jnp.float32, -k, k)
    w_hh = jax.random.uniform(ks[2], (hidden, 3 * hidden), jnp.float32, -k, k)
    b_ih = jax.random.uniform(ks[3], (3 * hidden,), jnp.float32, -k, k)
    b_hh = jax.random.uniform(ks[4], (3 * hidden,), jnp.float32, -k, k)

    # fc_out: orthogonal weight, zero bias
    w2 = ortho(ks[5], (hidden, out_features), jnp.float32)
    b2 = jnp.zeros((out_features,), jnp.float32)

    return {"w1": w1, "b1": b1, "w_ih": w_ih, "w_hh": w_hh,
            "b_ih": b_ih, "b_hh": b_hh, "w2": w2, "b2": b2}


def gru_policy_reference(x, params):
    """Pure-JAX reference matching PyTorch semantics (for correctness check)."""
    H = params["w1"].shape[1]
    a = jnp.maximum(x @ params["w1"] + params["b1"], 0.0)  # (S, B, H)

    def step(h, a_t):
        gi = a_t @ params["w_ih"] + params["b_ih"]
        gh = h @ params["w_hh"] + params["b_hh"]
        r = jax.nn.sigmoid(gi[:, :H] + gh[:, :H])
        z = jax.nn.sigmoid(gi[:, H:2 * H] + gh[:, H:2 * H])
        n = jnp.tanh(gi[:, 2 * H:] + r * gh[:, 2 * H:])
        h_new = (1.0 - z) * n + z * h
        return h_new, h_new

    h0 = jnp.zeros((x.shape[1], H), jnp.float32)
    h_last, hs = lax.scan(step, h0, a)
    o = jnp.maximum(hs, 0.0)
    logits = o @ params["w2"] + params["b2"]
    y = jax.nn.log_softmax(logits, axis=-1)
    return y, h_last[None]


if __name__ == "__main__":
    seq_len, batch = 8, 4
    in_features, hidden, out_features = 16, 32, 10

    key = jax.random.PRNGKey(0)
    k_params, k_x = jax.random.split(key)
    params = init_params(k_params, in_features, hidden, out_features)
    x = jax.random.normal(k_x, (seq_len, batch, in_features), jnp.float32)

    y, h = jax.jit(gru_policy_forward)(x, params)
    jax.block_until_ready((y, h))

    y_ref, h_ref = gru_policy_reference(x, params)
    assert y.shape == (seq_len, batch, out_features)
    assert h.shape == (1, batch, hidden)
    assert jnp.allclose(y, y_ref, atol=1e-5, rtol=1e-5)
    assert jnp.allclose(h, h_ref, atol=1e-5, rtol=1e-5)

    print("KERNEL_OK")
</pallas_src>

<mosaic_0001>
module attributes {stable_mosaic.version = 11 : i64} {
  func.func @_gru_policy_kernel(%arg0: i32, %arg1: memref<64x16xf32, #tpu.memory_space<vmem>>, %arg2: memref<16x32xf32, #tpu.memory_space<vmem>>, %arg3: memref<1x32xf32, #tpu.memory_space<vmem>>, %arg4: memref<32x96xf32, #tpu.memory_space<vmem>>, %arg5: memref<32x96xf32, #tpu.memory_space<vmem>>, %arg6: memref<1x64xf32, #tpu.memory_space<vmem>>, %arg7: memref<1x32xf32, #tpu.memory_space<vmem>>, %arg8: memref<1x32xf32, #tpu.memory_space<vmem>>, %arg9: memref<32x128xf32, #tpu.memory_space<vmem>>, %arg10: memref<1x128xf32, #tpu.memory_space<vmem>>, %arg11: memref<64x128xf32, #tpu.memory_space<vmem>>, %arg12: memref<8x32xf32, #tpu.memory_space<vmem>>) attributes {dimension_semantics = [#tpu.dimension_semantics<arbitrary>], iteration_bounds = array<i64: 1>, scalar_prefetch = 0 : i64, scratch_operands = 0 : i64, tpu.core_type = #tpu.core_type<tc>, window_params = [{pipeline_mode = #tpu.pipeline_mode<synchronous>, transform_indices = @transform_0, window_bounds = array<i64: 64, 16>}, {pipeline_mode = #tpu.pipeline_mode<synchronous>, transform_indices = @transform_1, window_bounds = array<i64: 16, 32>}, {pipeline_mode = #tpu.pipeline_mode<synchronous>, transform_indices = @transform_2, window_bounds = array<i64: 1, 32>}, {pipeline_mode = #tpu.pipeline_mode<synchronous>, transform_indices = @transform_3, window_bounds = array<i64: 32, 96>}, {pipeline_mode = #tpu.pipeline_mode<synchronous>, transform_indices = @transform_4, window_bounds = array<i64: 32, 96>}, {pipeline_mode = #tpu.pipeline_mode<synchronous>, transform_indices = @transform_5, window_bounds = array<i64: 1, 64>}, {pipeline_mode = #tpu.pipeline_mode<synchronous>, transform_indices = @transform_6, window_bounds = array<i64: 1, 32>}, {pipeline_mode = #tpu.pipeline_mode<synchronous>, transform_indices = @transform_7, window_bounds = array<i64: 1, 32>}, {pipeline_mode = #tpu.pipeline_mode<synchronous>, transform_indices = @transform_8, window_bounds = array<i64: 32, 128>}, {pipeline_mode = #tpu.pipeline_mode<synchronous>, transform_indices = @transform_9, window_bounds = array<i64: 1, 128>}, {pipeline_mode = #tpu.pipeline_mode<synchronous>, transform_indices = @transform_10, window_bounds = array<i64: 64, 128>}, {pipeline_mode = #tpu.pipeline_mode<synchronous>, transform_indices = @transform_11, window_bounds = array<i64: 8, 32>}]} {
    %c0 = arith.constant 0 : index
    %c0_0 = arith.constant 0 : index
    %0 = vector.load %arg1[%c0, %c0_0] : memref<64x16xf32, #tpu.memory_space<vmem>>, vector<64x16xf32>
    %c0_1 = arith.constant 0 : index
    %c0_2 = arith.constant 0 : index
    %1 = vector.load %arg2[%c0_1, %c0_2] : memref<16x32xf32, #tpu.memory_space<vmem>>, vector<16x32xf32>
    %cst = arith.constant dense<0.000000e+00> : vector<64x32xf32>
    %2 = tpu.matmul %0, %1, %cst {dimension_numbers = #tpu.dot_dimension_numbers<[1], [0], [0], [1], [0, 0, 1, 1], [], []>} : vector<64x16xf32>, vector<16x32xf32>, vector<64x32xf32> -> vector<64x32xf32>
    %c0_3 = arith.constant 0 : index
    %c0_4 = arith.constant 0 : index
    %3 = vector.load %arg3[%c0_3, %c0_4] : memref<1x32xf32, #tpu.memory_space<vmem>>, vector<1x32xf32>
    %4 = vector.broadcast %3 : vector<1x32xf32> to vector<64x32xf32>
    %5 = arith.addf %2, %4 : vector<64x32xf32>
    %cst_5 = arith.constant 0.000000e+00 : f32
    %6 = vector.broadcast %cst_5 : f32 to vector<64x32xf32>
    %7 = arith.maximumf %5, %6 : vector<64x32xf32>
    %c0_6 = arith.constant 0 : index
    %c0_7 = arith.constant 0 : index
    %8 = vector.load %arg4[%c0_6, %c0_7] : memref<32x96xf32, #tpu.memory_space<vmem>>, vector<32x96xf32>
    %c0_8 = arith.constant 0 : index
    %c0_9 = arith.constant 0 : index
    %9 = vector.load %arg5[%c0_8, %c0_9] : memref<32x96xf32, #tpu.memory_space<vmem>>, vector<32x96xf32>
    %c0_10 = arith.constant 0 : index
    %c0_11 = arith.constant 0 : index
    %10 = vector.load %arg6[%c0_10, %c0_11] : memref<1x64xf32, #tpu.memory_space<vmem>>, vector<1x64xf32>
    %c0_12 = arith.constant 0 : index
    %c0_13 = arith.constant 0 : index
    %11 = vector.load %arg7[%c0_12, %c0_13] : memref<1x32xf32, #tpu.memory_space<vmem>>, vector<1x32xf32>
    %c0_14 = arith.constant 0 : index
    %c0_15 = arith.constant 0 : index
    %12 = vector.load %arg8[%c0_14, %c0_15] : memref<1x32xf32, #tpu.memory_space<vmem>>, vector<1x32xf32>
    %cst_16 = arith.constant 0.000000e+00 : f32
    %13 = vector.broadcast %cst_16 : f32 to vector<8x32xf32>
    %14 = vector.extract_strided_slice %7 {offsets = [0, 0], sizes = [8, 32], strides = [1, 1]} : vector<64x32xf32> to vector<8x32xf32>
    %cst_17 = arith.constant dense<0.000000e+00> : vector<8x96xf32>
    %15 = tpu.matmul %14, %8, %cst_17 {dimension_numbers = #tpu.dot_dimension_numbers<[1], [0], [0], [1], [0, 0, 1, 1], [], []>} : vector<8x32xf32>, vector<32x96xf32>, vector<8x96xf32> -> vector<8x96xf32>
    %cst_18 = arith.constant dense<0.000000e+00> : vector<8x96xf32>
    %16 = tpu.matmul %13, %9, %cst_18 {dimension_numbers = #tpu.dot_dimension_numbers<[1], [0], [0], [1], [0, 0, 1, 1], [], []>} : vector<8x32xf32>, vector<32x96xf32>, vector<8x96xf32> -> vector<8x96xf32>
    %17 = vector.extract_strided_slice %15 {offsets = [0, 0], sizes = [8, 64], strides = [1, 1]} : vector<8x96xf32> to vector<8x64xf32>
    %18 = vector.extract_strided_slice %16 {offsets = [0, 0], sizes = [8, 64], strides = [1, 1]} : vector<8x96xf32> to vector<8x64xf32>
    %19 = arith.addf %17, %18 : vector<8x64xf32>
    %20 = vector.broadcast %10 : vector<1x64xf32> to vector<8x64xf32>
    %21 = arith.addf %19, %20 : vector<8x64xf32>
    %22 = arith.negf %21 : vector<8x64xf32>
    %23 = math.exp %22 : vector<8x64xf32>
    %cst_19 = arith.constant 1.000000e+00 : f32
    %24 = vector.broadcast %cst_19 : f32 to vector<8x64xf32>
    %25 = arith.addf %24, %23 : vector<8x64xf32>
    %26 = arith.divf %24, %25 : vector<8x64xf32>
    %27 = vector.extract_strided_slice %26 {offsets = [0, 0], sizes = [8, 32], strides = [1, 1]} : vector<8x64xf32> to vector<8x32xf32>
    %28 = vector.extract_strided_slice %26 {offsets = [0, 32], sizes = [8, 32], strides = [1, 1]} : vector<8x64xf32> to vector<8x32xf32>
    %29 = vector.extract_strided_slice %15 {offsets = [0, 64], sizes = [8, 32], strides = [1, 1]} : vector<8x96xf32> to vector<8x32xf32>
    %30 = vector.broadcast %11 : vector<1x32xf32> to vector<8x32xf32>
    %31 = arith.addf %29, %30 : vector<8x32xf32>
    %32 = vector.extract_strided_slice %16 {offsets = [0, 64], sizes = [8, 32], strides = [1, 1]} : vector<8x96xf32> to vector<8x32xf32>
    %33 = vector.broadcast %12 : vector<1x32xf32> to vector<8x32xf32>
    %34 = arith.addf %32, %33 : vector<8x32xf32>
    %35 = arith.mulf %27, %34 : vector<8x32xf32>
    %36 = arith.addf %31, %35 : vector<8x32xf32>
    %37 = math.tanh %36 : vector<8x32xf32>
    %cst_20 = arith.constant 1.000000e+00 : f32
    %38 = vector.broadcast %cst_20 : f32 to vector<8x32xf32>
    %39 = arith.subf %38, %28 : vector<8x32xf32>
    %40 = arith.mulf %39, %37 : vector<8x32xf32>
    %41 = arith.mulf %28, %13 : vector<8x32xf32>
    %42 = arith.addf %40, %41 : vector<8x32xf32>
    %43 = vector.extract_strided_slice %7 {offsets = [8, 0], sizes = [8, 32], strides = [1, 1]} : vector<64x32xf32> to vector<8x32xf32>
    %cst_21 = arith.constant dense<0.000000e+00> : vector<8x96xf32>
    %44 = tpu.matmul %43, %8, %cst_21 {dimension_numbers = #tpu.dot_dimension_numbers<[1], [0], [0], [1], [0, 0, 1, 1], [], []>} : vector<8x32xf32>, vector<32x96xf32>, vector<8x96xf32> -> vector<8x96xf32>
    %cst_22 = arith.constant dense<0.000000e+00> : vector<8x96xf32>
    %45 = tpu.matmul %42, %9, %cst_22 {dimension_numbers = #tpu.dot_dimension_numbers<[1], [0], [0], [1], [0, 0, 1, 1], [], []>} : vector<8x32xf32>, vector<32x96xf32>, vector<8x96xf32> -> vector<8x96xf32>
    %46 = vector.extract_strided_slice %44 {offsets = [0, 0], sizes = [8, 64], strides = [1, 1]} : vector<8x96xf32> to vector<8x64xf32>
    %47 = vector.extract_strided_slice %45 {offsets = [0, 0], sizes = [8, 64], strides = [1, 1]} : vector<8x96xf32> to vector<8x64xf32>
    %48 = arith.addf %46, %47 : vector<8x64xf32>
    %49 = vector.broadcast %10 : vector<1x64xf32> to vector<8x64xf32>
    %50 = arith.addf %48, %49 : vector<8x64xf32>
    %51 = arith.negf %50 : vector<8x64xf32>
    %52 = math.exp %51 : vector<8x64xf32>
    %cst_23 = arith.constant 1.000000e+00 : f32
    %53 = vector.broadcast %cst_23 : f32 to vector<8x64xf32>
    %54 = arith.addf %53, %52 : vector<8x64xf32>
    %55 = arith.divf %53, %54 : vector<8x64xf32>
    %56 = vector.extract_strided_slice %55 {offsets = [0, 0], sizes = [8, 32], strides = [1, 1]} : vector<8x64xf32> to vector<8x32xf32>
    %57 = vector.extract_strided_slice %55 {offsets = [0, 32], sizes = [8, 32], strides = [1, 1]} : vector<8x64xf32> to vector<8x32xf32>
    %58 = vector.extract_strided_slice %44 {offsets = [0, 64], sizes = [8, 32], strides = [1, 1]} : vector<8x96xf32> to vector<8x32xf32>
    %59 = vector.broadcast %11 : vector<1x32xf32> to vector<8x32xf32>
    %60 = arith.addf %58, %59 : vector<8x32xf32>
    %61 = vector.extract_strided_slice %45 {offsets = [0, 64], sizes = [8, 32], strides = [1, 1]} : vector<8x96xf32> to vector<8x32xf32>
    %62 = vector.broadcast %12 : vector<1x32xf32> to vector<8x32xf32>
    %63 = arith.addf %61, %62 : vector<8x32xf32>
    %64 = arith.mulf %56, %63 : vector<8x32xf32>
    %65 = arith.addf %60, %64 : vector<8x32xf32>
    %66 = math.tanh %65 : vector<8x32xf32>
    %cst_24 = arith.constant 1.000000e+00 : f32
    %67 = vector.broadcast %cst_24 : f32 to vector<8x32xf32>
    %68 = arith.subf %67, %57 : vector<8x32xf32>
    %69 = arith.mulf %68, %66 : vector<8x32xf32>
    %70 = arith.mulf %57, %42 : vector<8x32xf32>
    %71 = arith.addf %69, %70 : vector<8x32xf32>
    %72 = vector.extract_strided_slice %7 {offsets = [16, 0], sizes = [8, 32], strides = [1, 1]} : vector<64x32xf32> to vector<8x32xf32>
    %cst_25 = arith.constant dense<0.000000e+00> : vector<8x96xf32>
    %73 = tpu.matmul %72, %8, %cst_25 {dimension_numbers = #tpu.dot_dimension_numbers<[1], [0], [0], [1], [0, 0, 1, 1], [], []>} : vector<8x32xf32>, vector<32x96xf32>, vector<8x96xf32> -> vector<8x96xf32>
    %cst_26 = arith.constant dense<0.000000e+00> : vector<8x96xf32>
    %74 = tpu.matmul %71, %9, %cst_26 {dimension_numbers = #tpu.dot_dimension_numbers<[1], [0], [0], [1], [0, 0, 1, 1], [], []>} : vector<8x32xf32>, vector<32x96xf32>, vector<8x96xf32> -> vector<8x96xf32>
    %75 = vector.extract_strided_slice %73 {offsets = [0, 0], sizes = [8, 64], strides = [1, 1]} : vector<8x96xf32> to vector<8x64xf32>
    %76 = vector.extract_strided_slice %74 {offsets = [0, 0], sizes = [8, 64], strides = [1, 1]} : vector<8x96xf32> to vector<8x64xf32>
    %77 = arith.addf %75, %76 : vector<8x64xf32>
    %78 = vector.broadcast %10 : vector<1x64xf32> to vector<8x64xf32>
    %79 = arith.addf %77, %78 : vector<8x64xf32>
    %80 = arith.negf %79 : vector<8x64xf32>
    %81 = math.exp %80 : vector<8x64xf32>
    %cst_27 = arith.constant 1.000000e+00 : f32
    %82 = vector.broadcast %cst_27 : f32 to vector<8x64xf32>
    %83 = arith.addf %82, %81 : vector<8x64xf32>
    %84 = arith.divf %82, %83 : vector<8x64xf32>
    %85 = vector.extract_strided_slice %84 {offsets = [0, 0], sizes = [8, 32], strides = [1, 1]} : vector<8x64xf32> to vector<8x32xf32>
    %86 = vector.extract_strided_slice %84 {offsets = [0, 32], sizes = [8, 32], strides = [1, 1]} : vector<8x64xf32> to vector<8x32xf32>
    %87 = vector.extract_strided_slice %73 {offsets = [0, 64], sizes = [8, 32], strides = [1, 1]} : vector<8x96xf32> to vector<8x32xf32>
    %88 = vector.broadcast %11 : vector<1x32xf32> to vector<8x32xf32>
    %89 = arith.addf %87, %88 : vector<8x32xf32>
    %90 = vector.extract_strided_slice %74 {offsets = [0, 64], sizes = [8, 32], strides = [1, 1]} : vector<8x96xf32> to vector<8x32xf32>
    %91 = vector.broadcast %12 : vector<1x32xf32> to vector<8x32xf32>
    %92 = arith.addf %90, %91 : vector<8x32xf32>
    %93 = arith.mulf %85, %92 : vector<8x32xf32>
    %94 = arith.addf %89, %93 : vector<8x32xf32>
    %95 = math.tanh %94 : vector<8x32xf32>
    %cst_28 = arith.constant 1.000000e+00 : f32
    %96 = vector.broadcast %cst_28 : f32 to vector<8x32xf32>
    %97 = arith.subf %96, %86 : vector<8x32xf32>
    %98 = arith.mulf %97, %95 : vector<8x32xf32>
    %99 = arith.mulf %86, %71 : vector<8x32xf32>
    %100 = arith.addf %98, %99 : vector<8x32xf32>
    %101 = vector.extract_strided_slice %7 {offsets = [24, 0], sizes = [8, 32], strides = [1, 1]} : vector<64x32xf32> to vector<8x32xf32>
    %cst_29 = arith.constant dense<0.000000e+00> : vector<8x96xf32>
    %102 = tpu.matmul %101, %8, %cst_29 {dimension_numbers = #tpu.dot_dimension_numbers<[1], [0], [0], [1], [0, 0, 1, 1], [], []>} : vector<8x32xf32>, vector<32x96xf32>, vector<8x96xf32> -> vector<8x96xf32>
    %cst_30 = arith.constant dense<0.000000e+00> : vector<8x96xf32>
    %103 = tpu.matmul %100, %9, %cst_30 {dimension_numbers = #tpu.dot_dimension_numbers<[1], [0], [0], [1], [0, 0, 1, 1], [], []>} : vector<8x32xf32>, vector<32x96xf32>, vector<8x96xf32> -> vector<8x96xf32>
    %104 = vector.extract_strided_slice %102 {offsets = [0, 0], sizes = [8, 64], strides = [1, 1]} : vector<8x96xf32> to vector<8x64xf32>
    %105 = vector.extract_strided_slice %103 {offsets = [0, 0], sizes = [8, 64], strides = [1, 1]} : vector<8x96xf32> to vector<8x64xf32>
    %106 = arith.addf %104, %105 : vector<8x64xf32>
    %107 = vector.broadcast %10 : vector<1x64xf32> to vector<8x64xf32>
    %108 = arith.addf %106, %107 : vector<8x64xf32>
    %109 = arith.negf %108 : vector<8x64xf32>
    %110 = math.exp %109 : vector<8x64xf32>
    %cst_31 = arith.constant 1.000000e+00 : f32
    %111 = vector.broadcast %cst_31 : f32 to vector<8x64xf32>
    %112 = arith.addf %111, %110 : vector<8x64xf32>
    %113 = arith.divf %111, %112 : vector<8x64xf32>
    %114 = vector.extract_strided_slice %113 {offsets = [0, 0], sizes = [8, 32], strides = [1, 1]} : vector<8x64xf32> to vector<8x32xf32>
    %115 = vector.extract_strided_slice %113 {offsets = [0, 32], sizes = [8, 32], strides = [1, 1]} : vector<8x64xf32> to vector<8x32xf32>
    %116 = vector.extract_strided_slice %102 {offsets = [0, 64], sizes = [8, 32], strides = [1, 1]} : vector<8x96xf32> to vector<8x32xf32>
    %117 = vector.broadcast %11 : vector<1x32xf32> to vector<8x32xf32>
    %118 = arith.addf %116, %117 : vector<8x32xf32>
    %119 = vector.extract_strided_slice %103 {offsets = [0, 64], sizes = [8, 32], strides = [1, 1]} : vector<8x96xf32> to vector<8x32xf32>
    %120 = vector.broadcast %12 : vector<1x32xf32> to vector<8x32xf32>
    %121 = arith.addf %119, %120 : vector<8x32xf32>
    %122 = arith.mulf %114, %121 : vector<8x32xf32>
    %123 = arith.addf %118, %122 : vector<8x32xf32>
    %124 = math.tanh %123 : vector<8x32xf32>
    %cst_32 = arith.constant 1.000000e+00 : f32
    %125 = vector.broadcast %cst_32 : f32 to vector<8x32xf32>
    %126 = arith.subf %125, %115 : vector<8x32xf32>
    %127 = arith.mulf %126, %124 : vector<8x32xf32>
    %128 = arith.mulf %115, %100 : vector<8x32xf32>
    %129 = arith.addf %127, %128 : vector<8x32xf32>
    %130 = vector.extract_strided_slice %7 {offsets = [32, 0], sizes = [8, 32], strides = [1, 1]} : vector<64x32xf32> to vector<8x32xf32>
    %cst_33 = arith.constant dense<0.000000e+00> : vector<8x96xf32>
    %131 = tpu.matmul %130, %8, %cst_33 {dimension_numbers = #tpu.dot_dimension_numbers<[1], [0], [0], [1], [0, 0, 1, 1], [], []>} : vector<8x32xf32>, vector<32x96xf32>, vector<8x96xf32> -> vector<8x96xf32>
    %cst_34 = arith.constant dense<0.000000e+00> : vector<8x96xf32>
    %132 = tpu.matmul %129, %9, %cst_34 {dimension_numbers = #tpu.dot_dimension_numbers<[1], [0], [0], [1], [0, 0, 1, 1], [], []>} : vector<8x32xf32>, vector<32x96xf32>, vector<8x96xf32> -> vector<8x96xf32>
    %133 = vector.extract_strided_slice %131 {offsets = [0, 0], sizes = [8, 64], strides = [1, 1]} : vector<8x96xf32> to vector<8x64xf32>
    %134 = vector.extract_strided_slice %132 {offsets = [0, 0], sizes = [8, 64], strides = [1, 1]} : vector<8x96xf32> to vector<8x64xf32>
    %135 = arith.addf %133, %134 : vector<8x64xf32>
    %136 = vector.broadcast %10 : vector<1x64xf32> to vector<8x64xf32>
    %137 = arith.addf %135, %136 : vector<8x64xf32>
    %138 = arith.negf %137 : vector<8x64xf32>
    %139 = math.exp %138 : vector<8x64xf32>
    %cst_35 = arith.constant 1.000000e+00 : f32
    %140 = vector.broadcast %cst_35 : f32 to vector<8x64xf32>
    %141 = arith.addf %140, %139 : vector<8x64xf32>
    %142 = arith.divf %140, %141 : vector<8x64xf32>
    %143 = vector.extract_strided_slice %142 {offsets = [0, 0], sizes = [8, 32], strides = [1, 1]} : vector<8x64xf32> to vector<8x32xf32>
    %144 = vector.extract_strided_slice %142 {offsets = [0, 32], sizes = [8, 32], strides = [1, 1]} : vector<8x64xf32> to vector<8x32xf32>
    %145 = vector.extract_strided_slice %131 {offsets = [0, 64], sizes = [8, 32], strides = [1, 1]} : vector<8x96xf32> to vector<8x32xf32>
    %146 = vector.broadcast %11 : vector<1x32xf32> to vector<8x32xf32>
    %147 = arith.addf %145, %146 : vector<8x32xf32>
    %148 = vector.extract_strided_slice %132 {offsets = [0, 64], sizes = [8, 32], strides = [1, 1]} : vector<8x96xf32> to vector<8x32xf32>
    %149 = vector.broadcast %12 : vector<1x32xf32> to vector<8x32xf32>
    %150 = arith.addf %148, %149 : vector<8x32xf32>
    %151 = arith.mulf %143, %150 : vector<8x32xf32>
    %152 = arith.addf %147, %151 : vector<8x32xf32>
    %153 = math.tanh %152 : vector<8x32xf32>
    %cst_36 = arith.constant 1.000000e+00 : f32
    %154 = vector.broadcast %cst_36 : f32 to vector<8x32xf32>
    %155 = arith.subf %154, %144 : vector<8x32xf32>
    %156 = arith.mulf %155, %153 : vector<8x32xf32>
    %157 = arith.mulf %144, %129 : vector<8x32xf32>
    %158 = arith.addf %156, %157 : vector<8x32xf32>
    %159 = vector.extract_strided_slice %7 {offsets = [40, 0], sizes = [8, 32], strides = [1, 1]} : vector<64x32xf32> to vector<8x32xf32>
    %cst_37 = arith.constant dense<0.000000e+00> : vector<8x96xf32>
    %160 = tpu.matmul %159, %8, %cst_37 {dimension_numbers = #tpu.dot_dimension_numbers<[1], [0], [0], [1], [0, 0, 1, 1], [], []>} : vector<8x32xf32>, vector<32x96xf32>, vector<8x96xf32> -> vector<8x96xf32>
    %cst_38 = arith.constant dense<0.000000e+00> : vector<8x96xf32>
    %161 = tpu.matmul %158, %9, %cst_38 {dimension_numbers = #tpu.dot_dimension_numbers<[1], [0], [0], [1], [0, 0, 1, 1], [], []>} : vector<8x32xf32>, vector<32x96xf32>, vector<8x96xf32> -> vector<8x96xf32>
    %162 = vector.extract_strided_slice %160 {offsets = [0, 0], sizes = [8, 64], strides = [1, 1]} : vector<8x96xf32> to vector<8x64xf32>
    %163 = vector.extract_strided_slice %161 {offsets = [0, 0], sizes = [8, 64], strides = [1, 1]} : vector<8x96xf32> to vector<8x64xf32>
    %164 = arith.addf %162, %163 : vector<8x64xf32>
    %165 = vector.broadcast %10 : vector<1x64xf32> to vector<8x64xf32>
    %166 = arith.addf %164, %165 : vector<8x64xf32>
    %167 = arith.negf %166 : vector<8x64xf32>
    %168 = math.exp %167 : vector<8x64xf32>
    %cst_39 = arith.constant 1.000000e+00 : f32
    %169 = vector.broadcast %cst_39 : f32 to vector<8x64xf32>
    %170 = arith.addf %169, %168 : vector<8x64xf32>
    %171 = arith.divf %169, %170 : vector<8x64xf32>
    %172 = vector.extract_strided_slice %171 {offsets = [0, 0], sizes = [8, 32], strides = [1, 1]} : vector<8x64xf32> to vector<8x32xf32>
    %173 = vector.extract_strided_slice %171 {offsets = [0, 32], sizes = [8, 32], strides = [1, 1]} : vector<8x64xf32> to vector<8x32xf32>
    %174 = vector.extract_strided_slice %160 {offsets = [0, 64], sizes = [8, 32], strides = [1, 1]} : vector<8x96xf32> to vector<8x32xf32>
    %175 = vector.broadcast %11 : vector<1x32xf32> to vector<8x32xf32>
    %176 = arith.addf %174, %175 : vector<8x32xf32>
    %177 = vector.extract_strided_slice %161 {offsets = [0, 64], sizes = [8, 32], strides = [1, 1]} : vector<8x96xf32> to vector<8x32xf32>
    %178 = vector.broadcast %12 : vector<1x32xf32> to vector<8x32xf32>
    %179 = arith.addf %177, %178 : vector<8x32xf32>
    %180 = arith.mulf %172, %179 : vector<8x32xf32>
    %181 = arith.addf %176, %180 : vector<8x32xf32>
    %182 = math.tanh %181 : vector<8x32xf32>
    %cst_40 = arith.constant 1.000000e+00 : f32
    %183 = vector.broadcast %cst_40 : f32 to vector<8x32xf32>
    %184 = arith.subf %183, %173 : vector<8x32xf32>
    %185 = arith.mulf %184, %182 : vector<8x32xf32>
    %186 = arith.mulf %173, %158 : vector<8x32xf32>
    %187 = arith.addf %185, %186 : vector<8x32xf32>
    %188 = vector.extract_strided_slice %7 {offsets = [48, 0], sizes = [8, 32], strides = [1, 1]} : vector<64x32xf32> to vector<8x32xf32>
    %cst_41 = arith.constant dense<0.000000e+00> : vector<8x96xf32>
    %189 = tpu.matmul %188, %8, %cst_41 {dimension_numbers = #tpu.dot_dimension_numbers<[1], [0], [0], [1], [0, 0, 1, 1], [], []>} : vector<8x32xf32>, vector<32x96xf32>, vector<8x96xf32> -> vector<8x96xf32>
    %cst_42 = arith.constant dense<0.000000e+00> : vector<8x96xf32>
    %190 = tpu.matmul %187, %9, %cst_42 {dimension_numbers = #tpu.dot_dimension_numbers<[1], [0], [0], [1], [0, 0, 1, 1], [], []>} : vector<8x32xf32>, vector<32x96xf32>, vector<8x96xf32> -> vector<8x96xf32>
    %191 = vector.extract_strided_slice %189 {offsets = [0, 0], sizes = [8, 64], strides = [1, 1]} : vector<8x96xf32> to vector<8x64xf32>
    %192 = vector.extract_strided_slice %190 {offsets = [0, 0], sizes = [8, 64], strides = [1, 1]} : vector<8x96xf32> to vector<8x64xf32>
    %193 = arith.addf %191, %192 : vector<8x64xf32>
    %194 = vector.broadcast %10 : vector<1x64xf32> to vector<8x64xf32>
    %195 = arith.addf %193, %194 : vector<8x64xf32>
    %196 = arith.negf %195 : vector<8x64xf32>
    %197 = math.exp %196 : vector<8x64xf32>
    %cst_43 = arith.constant 1.000000e+00 : f32
    %198 = vector.broadcast %cst_43 : f32 to vector<8x64xf32>
    %199 = arith.addf %198, %197 : vector<8x64xf32>
    %200 = arith.divf %198, %199 : vector<8x64xf32>
    %201 = vector.extract_strided_slice %200 {offsets = [0, 0], sizes = [8, 32], strides = [1, 1]} : vector<8x64xf32> to vector<8x32xf32>
    %202 = vector.extract_strided_slice %200 {offsets = [0, 32], sizes = [8, 32], strides = [1, 1]} : vector<8x64xf32> to vector<8x32xf32>
    %203 = vector.extract_strided_slice %189 {offsets = [0, 64], sizes = [8, 32], strides = [1, 1]} : vector<8x96xf32> to vector<8x32xf32>
    %204 = vector.broadcast %11 : vector<1x32xf32> to vector<8x32xf32>
    %205 = arith.addf %203, %204 : vector<8x32xf32>
    %206 = vector.extract_strided_slice %190 {offsets = [0, 64], sizes = [8, 32], strides = [1, 1]} : vector<8x96xf32> to vector<8x32xf32>
    %207 = vector.broadcast %12 : vector<1x32xf32> to vector<8x32xf32>
    %208 = arith.addf %206, %207 : vector<8x32xf32>
    %209 = arith.mulf %201, %208 : vector<8x32xf32>
    %210 = arith.addf %205, %209 : vector<8x32xf32>
    %211 = math.tanh %210 : vector<8x32xf32>
    %cst_44 = arith.constant 1.000000e+00 : f32
    %212 = vector.broadcast %cst_44 : f32 to vector<8x32xf32>
    %213 = arith.subf %212, %202 : vector<8x32xf32>
    %214 = arith.mulf %213, %211 : vector<8x32xf32>
    %215 = arith.mulf %202, %187 : vector<8x32xf32>
    %216 = arith.addf %214, %215 : vector<8x32xf32>
    %217 = vector.extract_strided_slice %7 {offsets = [56, 0], sizes = [8, 32], strides = [1, 1]} : vector<64x32xf32> to vector<8x32xf32>
    %cst_45 = arith.constant dense<0.000000e+00> : vector<8x96xf32>
    %218 = tpu.matmul %217, %8, %cst_45 {dimension_numbers = #tpu.dot_dimension_numbers<[1], [0], [0], [1], [0, 0, 1, 1], [], []>} : vector<8x32xf32>, vector<32x96xf32>, vector<8x96xf32> -> vector<8x96xf32>
    %cst_46 = arith.constant dense<0.000000e+00> : vector<8x96xf32>
    %219 = tpu.matmul %216, %9, %cst_46 {dimension_numbers = #tpu.dot_dimension_numbers<[1], [0], [0], [1], [0, 0, 1, 1], [], []>} : vector<8x32xf32>, vector<32x96xf32>, vector<8x96xf32> -> vector<8x96xf32>
    %220 = vector.extract_strided_slice %218 {offsets = [0, 0], sizes = [8, 64], strides = [1, 1]} : vector<8x96xf32> to vector<8x64xf32>
    %221 = vector.extract_strided_slice %219 {offsets = [0, 0], sizes = [8, 64], strides = [1, 1]} : vector<8x96xf32> to vector<8x64xf32>
    %222 = arith.addf %220, %221 : vector<8x64xf32>
    %223 = vector.broadcast %10 : vector<1x64xf32> to vector<8x64xf32>
    %224 = arith.addf %222, %223 : vector<8x64xf32>
    %225 = arith.negf %224 : vector<8x64xf32>
    %226 = math.exp %225 : vector<8x64xf32>
    %cst_47 = arith.constant 1.000000e+00 : f32
    %227 = vector.broadcast %cst_47 : f32 to vector<8x64xf32>
    %228 = arith.addf %227, %226 : vector<8x64xf32>
    %229 = arith.divf %227, %228 : vector<8x64xf32>
    %230 = vector.extract_strided_slice %229 {offsets = [0, 0], sizes = [8, 32], strides = [1, 1]} : vector<8x64xf32> to vector<8x32xf32>
    %231 = vector.extract_strided_slice %229 {offsets = [0, 32], sizes = [8, 32], strides = [1, 1]} : vector<8x64xf32> to vector<8x32xf32>
    %232 = vector.extract_strided_slice %218 {offsets = [0, 64], sizes = [8, 32], strides = [1, 1]} : vector<8x96xf32> to vector<8x32xf32>
    %233 = vector.broadcast %11 : vector<1x32xf32> to vector<8x32xf32>
    %234 = arith.addf %232, %233 : vector<8x32xf32>
    %235 = vector.extract_strided_slice %219 {offsets = [0, 64], sizes = [8, 32], strides = [1, 1]} : vector<8x96xf32> to vector<8x32xf32>
    %236 = vector.broadcast %12 : vector<1x32xf32> to vector<8x32xf32>
    %237 = arith.addf %235, %236 : vector<8x32xf32>
    %238 = arith.mulf %230, %237 : vector<8x32xf32>
    %239 = arith.addf %234, %238 : vector<8x32xf32>
    %240 = math.tanh %239 : vector<8x32xf32>
    %cst_48 = arith.constant 1.000000e+00 : f32
    %241 = vector.broadcast %cst_48 : f32 to vector<8x32xf32>
    %242 = arith.subf %241, %231 : vector<8x32xf32>
    %243 = arith.mulf %242, %240 : vector<8x32xf32>
    %244 = arith.mulf %231, %216 : vector<8x32xf32>
    %245 = arith.addf %243, %244 : vector<8x32xf32>
    %246 = tpu.concatenate %42, %71, %100, %129, %158, %187, %216, %245 in 0 : vector<8x32xf32>, vector<8x32xf32>, vector<8x32xf32>, vector<8x32xf32>, vector<8x32xf32>, vector<8x32xf32>, vector<8x32xf32>, vector<8x32xf32> -> vector<64x32xf32>
    %cst_49 = arith.constant 0.000000e+00 : f32
    %247 = vector.broadcast %cst_49 : f32 to vector<64x32xf32>
    %248 = arith.maximumf %246, %247 : vector<64x32xf32>
    %c0_50 = arith.constant 0 : index
    %c0_51 = arith.constant 0 : index
    %249 = vector.load %arg9[%c0_50, %c0_51] : memref<32x128xf32, #tpu.memory_space<vmem>>, vector<32x128xf32>
    %cst_52 = arith.constant dense<0.000000e+00> : vector<64x128xf32>
    %250 = tpu.matmul %248, %249, %cst_52 {dimension_numbers = #tpu.dot_dimension_numbers<[1], [0], [0], [1], [0, 0, 1, 1], [], []>} : vector<64x32xf32>, vector<32x128xf32>, vector<64x128xf32> -> vector<64x128xf32>
    %c0_53 = arith.constant 0 : index
    %c0_54 = arith.constant 0 : index
    %251 = vector.load %arg10[%c0_53, %c0_54] : memref<1x128xf32, #tpu.memory_space<vmem>>, vector<1x128xf32>
    %252 = vector.broadcast %251 : vector<1x128xf32> to vector<64x128xf32>
    %253 = arith.addf %250, %252 : vector<64x128xf32>
    %cst_55 = arith.constant dense<0xFF800000> : vector<64xf32>
    %254 = vector.multi_reduction <maximumf>, %253, %cst_55 [1] : vector<64x128xf32> to vector<64xf32>
    %255 = vector.shape_cast %254 : vector<64xf32> to vector<64x1xf32>
    %256 = vector.broadcast %255 : vector<64x1xf32> to vector<64x128xf32>
    %257 = arith.subf %253, %256 : vector<64x128xf32>
    %258 = math.exp %257 : vector<64x128xf32>
    %cst_56 = arith.constant dense<0.000000e+00> : vector<64xf32>
    %259 = vector.multi_reduction <add>, %258, %cst_56 [1] : vector<64x128xf32> to vector<64xf32>
    %260 = vector.shape_cast %259 : vector<64xf32> to vector<64x1xf32>
    %261 = math.log %260 : vector<64x1xf32>
    %262 = arith.addf %261, %255 : vector<64x1xf32>
    %263 = vector.broadcast %262 : vector<64x1xf32> to vector<64x128xf32>
    %264 = arith.subf %253, %263 : vector<64x128xf32>
    %c0_57 = arith.constant 0 : index
    %c0_58 = arith.constant 0 : index
    %265 = vector.load %arg11[%c0_57, %c0_58] : memref<64x128xf32, #tpu.memory_space<vmem>>, vector<64x128xf32>
    tpu.vector_store %arg11[%c0_57, %c0_58], %264 {strides = array<i32>} : memref<64x128xf32, #tpu.memory_space<vmem>>, vector<64x128xf32>,
    %c0_59 = arith.constant 0 : index
    %c0_60 = arith.constant 0 : index
    %266 = vector.load %arg12[%c0_59, %c0_60] : memref<8x32xf32, #tpu.memory_space<vmem>>, vector<8x32xf32>
    tpu.vector_store %arg12[%c0_59, %c0_60], %245 {strides = array<i32>} : memref<8x32xf32, #tpu.memory_space<vmem>>, vector<8x32xf32>,
    return
  }
  func.func @transform_0(%arg0: i32) -> (i32, i32) {
    %c0_i32 = arith.constant 0 : i32
    %c0_i32_0 = arith.constant 0 : i32
    %c0_i32_1 = arith.constant 0 : i32
    return %c0_i32, %c0_i32_0 : i32, i32
  }
  func.func @transform_1(%arg0: i32) -> (i32, i32) {
    %c0_i32 = arith.constant 0 : i32
    %c0_i32_0 = arith.constant 0 : i32
    %c0_i32_1 = arith.constant 0 : i32
    return %c0_i32, %c0_i32_0 : i32, i32
  }
  func.func @transform_2(%arg0: i32) -> (i32, i32) {
    %c0_i32 = arith.constant 0 : i32
    %c0_i32_0 = arith.constant 0 : i32
    %c0_i32_1 = arith.constant 0 : i32
    return %c0_i32, %c0_i32_0 : i32, i32
  }
  func.func @transform_3(%arg0: i32) -> (i32, i32) {
    %c0_i32 = arith.constant 0 : i32
    %c0_i32_0 = arith.constant 0 : i32
    %c0_i32_1 = arith.constant 0 : i32
    return %c0_i32, %c0_i32_0 : i32, i32
  }
  func.func @transform_4(%arg0: i32) -> (i32, i32) {
    %c0_i32 = arith.constant 0 : i32
    %c0_i32_0 = arith.constant 0 : i32
    %c0_i32_1 = arith.constant 0 : i32
    return %c0_i32, %c0_i32_0 : i32, i32
  }
  func.func @transform_5(%arg0: i32) -> (i32, i32) {
    %c0_i32 = arith.constant 0 : i32
    %c0_i32_0 = arith.constant 0 : i32
    %c0_i32_1 = arith.constant 0 : i32
    return %c0_i32, %c0_i32_0 : i32, i32
  }
  func.func @transform_6(%arg0: i32) -> (i32, i32) {
    %c0_i32 = arith.constant 0 : i32
    %c0_i32_0 = arith.constant 0 : i32
    %c0_i32_1 = arith.constant 0 : i32
    return %c0_i32, %c0_i32_0 : i32, i32
  }
  func.func @transform_7(%arg0: i32) -> (i32, i32) {
    %c0_i32 = arith.constant 0 : i32
    %c0_i32_0 = arith.constant 0 : i32
    %c0_i32_1 = arith.constant 0 : i32
    return %c0_i32, %c0_i32_0 : i32, i32
  }
  func.func @transform_8(%arg0: i32) -> (i32, i32) {
    %c0_i32 = arith.constant 0 : i32
    %c0_i32_0 = arith.constant 0 : i32
    %c0_i32_1 = arith.constant 0 : i32
    return %c0_i32, %c0_i32_0 : i32, i32
  }
  func.func @transform_9(%arg0: i32) -> (i32, i32) {
    %c0_i32 = arith.constant 0 : i32
    %c0_i32_0 = arith.constant 0 : i32
    %c0_i32_1 = arith.constant 0 : i32
    return %c0_i32, %c0_i32_0 : i32, i32
  }
  func.func @transform_10(%arg0: i32) -> (i32, i32) {
    %c0_i32 = arith.constant 0 : i32
    %c0_i32_0 = arith.constant 0 : i32
    %c0_i32_1 = arith.constant 0 : i32
    return %c0_i32, %c0_i32_0 : i32, i32
  }
  func.func @transform_11(%arg0: i32) -> (i32, i32) {
    %c0_i32 = arith.constant 0 : i32
    %c0_i32_0 = arith.constant 0 : i32
    %c0_i32_1 = arith.constant 0 : i32
    return %c0_i32, %c0_i32_0 : i32, i32
  }
}

</mosaic_0001>

<bundles_post_ra>
// kernel: gru_policy_forward.1
= control target key start
LH: loop header
LB: loop body
LE: loop exit
PB: predicated region body
PF: predicated region fallthrough
CT: control target
= control target key end

     0   :  { %vm54_vm0 = vcmask 130048   ;;  %v2466_v11 = vmov 0.0|0.0   ;;  %vm2467_vm1 = vmmov 0   ;;  %v2468_v18 = vmov 0.0   ;;  %s2469_s27 = smov 64   ;;  %s2992_s1 = inlined_call_operand.vmem [shape: f32[16,32], index: 1, kind: input, shape index: {}]   ;;  %s2993_s0 = inlined_call_operand.vmem [shape: f32[64,16], index: 0, kind: input, shape index: {}]   ;;  %s2994_s3 = inlined_call_operand.vmem [shape: f32[32,96], index: 3, kind: input, shape index: {}]   ;;  %s2995_s6 = inlined_call_operand.vmem [shape: f32[1,32], index: 6, kind: input, shape index: {}]   ;;  %s2996_s7 = inlined_call_operand.vmem [shape: f32[1,32], index: 7, kind: input, shape index: {}]   ;;  %s2997_s2 = inlined_call_operand.vmem [shape: f32[1,32], index: 2, kind: input, shape index: {}]   ;;  %s2998_s4 = inlined_call_operand.vmem [shape: f32[32,96], index: 4, kind: input, shape index: {}]   ;;  %s2999_s5 = inlined_call_operand.vmem [shape: f32[1,64], index: 5, kind: input, shape index: {}]   ;;  %s3000_s8 = inlined_call_operand.vmem [shape: f32[32,128], index: 8, kind: input, shape index: {}]   ;;  %s3001_s9 = inlined_call_operand.vmem [shape: f32[1,128], index: 9, kind: input, shape index: {}]   ;;  %s3002_s10 = inlined_call_operand.vmem [shape: f32[64,128], index: 10, kind: output, shape index: {0}]   ;;  %s3003_s11 = inlined_call_operand.vmem [shape: f32[8,32], index: 11, kind: output, shape index: {1}]  }
   0x1   :  { %v45_v0 = vld [vmem:[%s2992_s1] sm:$0xff]  ;;  %v46_v1 = vld [vmem:[%s2992_s1 + $0x8] sm:$0xff]  ;;  %v39_v9 = vld [vmem:[%s2993_s0 + $0x10] sm:$0xff]  ;;  %vm203_vm2 = vcmask 261120  }
   0x2   :  { %v37_v2 = vld [vmem:[%s2993_s0] sm:$0xff]  ;;  %v2271_v3 = vpack.c.bf16 %v46_v1, %v45_v0  ;;  %v193_v6 = vld [vmem:[%s2994_s3 + $0x8] sm:$0xff]  ;;  %v43_v10 = vld [vmem:[%s2993_s0 + $0x30] sm:$0xff] }
   0x3   :  { %2063 = vmatprep.mubr.msk.f32.mxu0 %vm54_vm0, %v37_v2  ;;  %v41_v4 = vld [vmem:[%s2993_s0 + $0x20] sm:$0xff]  ;;  %v38_v7 = vld [vmem:[%s2993_s0 + $0x8] sm:$0xff]  ;;  %v40_v13 = vld [vmem:[%s2993_s0 + $0x18] sm:$0xff] }
   0x4   :  { %2272 = vmatprep.subr.bf16.mxu0 %v2271_v3  ;;  %2379 = vmatprep.subr.bf16.mxu1 %v2271_v3  ;;  %v192_v5 = vld [vmem:[%s2994_s3] sm:$0xff]  ;;  %v42_v8 = vld [vmem:[%s2993_s0 + $0x28] sm:$0xff]  ;;  %v44_v14 = vld [vmem:[%s2993_s0 + $0x38] sm:$0xff] }
   0x5   :  { %2274 = vmatpush3.bf16.msra.mxu0 %v2271_v3  ;;  %2380 = vmatpush3.bf16.msra.mxu1 %v2271_v3  ;;  %v2564_v12 = vpack.c.bf16 %v193_v6, %v192_v5  ;;  %v194_v15 = vld [vmem:[%s2994_s3 + $0x10] sm:$0xff]  ;;  %v195_v16 = vld [vmem:[%s2994_s3 + $0x18] sm:$0xff]  ;;  %v1925_v19 = vld [vmem:[%s2995_s6] ss:$0 sm:$0xff] }
   0x6   :  { %2069 = vmatprep.mubr.msk.f32.mxu1 %vm54_vm0, %v41_v4  ;;  %2275 = vmatprep.subr.bf16.mxu1 %v2466_v11  ;;  %v2589_v17 = vpack.c.bf16 %v195_v16, %v194_v15  ;;  %v1926_v20 = vld [vmem:[%s2996_s7] ss:$0 sm:$0xff]  ;;  %v197_v24 = vld [vmem:[%s2998_s4 + $0x8] sm:$0xff]  ;;  %v198_v33 = vld [vmem:[%s2998_s4 + $0x10] sm:$0xff] }
   0x7   :  { %2287 = vmatprep.subr.bf16.mxu0 %v2466_v11  ;;  %369 = vrot.lane.b32.xlu1 %v1925_v19, %s2469_s27  ;;  %v2610_v21 = vld [vmem:[%s2997_s2] ss:$0 sm:$0xff]  ;;  %v199_v34 = vld [vmem:[%s2998_s4 + $0x18] sm:$0xff] }
   0x8   :  { %2064 = vmatmul.mubr.msk.f32.vlgmr.msra.gmra.mrb[0].mxu0 %vm54_vm0, %v38_v7  ;;  %2070 = vmatmul.mubr.msk.f32.vlgmr.msra.gmra.mrb[0].mxu1 %vm54_vm0, %v42_v8  ;;  %v196_v23 = vld [vmem:[%s2998_s4] sm:$0xff]  ;;  %v2633_v40 = vpack.c.bf16 %v199_v34, %v198_v33 }
   0x9   :  { %2066 = vmatprep.mubr.msk.f32.mxu0 %vm54_vm0, %v39_v9  ;;  %2072 = vmatprep.mubr.msk.f32.mxu1 %vm54_vm0, %v43_v10  ;;  %v2620_v31 = vpack.c.bf16 %v197_v24, %v196_v23  ;;  %v2713_v9 = vld [vmem:[%s2999_s5] ss:$0 sm:$0xff]  ;;  %s2470_s5 = smov 96  }
   0xa   :  { %2277 = vmatpush3.bf16.msra.mxu1 %v2564_v12  ;;  %2289 = vmatpush3.bf16.msra.mxu0 %v2564_v12 }
   0xb   :  { %2278 = vmatprep.subr.bf16.mxu1 %v2466_v11  ;;  %2290 = vmatprep.subr.bf16.mxu0 %v2466_v11 }
   0xc   :  { %2067 = vmatmul.mubr.msk.f32.gmra.mrb[2].mxu0 %vm54_vm0, %v40_v13  ;;  %2073 = vmatmul.mubr.msk.f32.gmra.mrb[2].mxu1 %vm54_vm0, %v44_v14 }
   0xd   :  { %2105 = vmatprep.mubr.msk.f32.mxu0 %vm2467_vm1, %v2468_v18  ;;  %2083 = vmatprep.mubr.msk.f32.mxu1 %vm2467_vm1, %v2468_v18 }
   0xe   :  { %2280 = vmatpush3.bf16.msra.mxu1 %v2589_v17  ;;  %2292 = vmatpush3.bf16.msra.mxu0 %v2589_v17 }
   0xf   :  { %2281 = vmatprep.subr.bf16.mxu1 %v2466_v11  ;;  %2299 = vmatprep.subr.bf16.mxu0 %v2466_v11 }
  0x10   :  { %378 = vrot.lane.b32.xlu0 %v1926_v20, %s2469_s27 }
  0x79   :  { %v2717_v19 = vpop.permute.xlu1 %369 }
  0x82   :  { %v2694_v56 = vpop.permute.xlu0 %378 }
  0xdb   :  { %v2065_v22 = vpop.f32.mrb[0].mxu0  ;;  %v2071_v25 = vpop.f32.mrb[0].mxu1 }
  0xdc   :  { %v151_v26 = vadd.f32 %v2065_v22, %v2610_v21  ;;  %v145_v27 = vpop.f32.mrb[1].mxu0  ;;  %v165_v28 = vpop.f32.mrb[1].mxu1  ;;  %v171_v46 = vadd.f32 %v2071_v25, %v2610_v21 }
  0xdd   :  { %v146_v29 = vadd.f32 %v2610_v21, %v145_v27  ;;  %v166_v44 = vadd.f32 %v2610_v21, %v165_v28 }
  0xde   :  { %v185_v30 = vmax.f32 %v151_v26, 0.0  ;;  %v189_v47 = vmax.f32 %v171_v46, 0.0 }
  0xdf   :  { %v184_v32 = vmax.f32 %v146_v29, 0.0  ;;  %v2068_v35 = vpop.f32.mrb[2].mxu0  ;;  %v2074_v36 = vpop.f32.mrb[2].mxu1  ;;  %v188_v45 = vmax.f32 %v166_v44, 0.0 }
  0xe0   :  { %2106 = vmatmul.mubr.msk.f32.vlgmr.msra.gmra.mrb[4].mxu0 %vm203_vm2, %v185_v30  ;;  %v155_v37 = vpop.f32.mrb[3].mxu0  ;;  %v175_v38 = vpop.f32.mrb[3].mxu1  ;;  %v161_v42 = vadd.f32 %v2068_v35, %v2610_v21  ;;  %v181_v50 = vadd.f32 %v2074_v36, %v2610_v21 }
  0xe1   :  { %2084 = vmatmul.mubr.msk.f32.vlgmr.msra.gmra.mrb[4].mxu1 %vm203_vm2, %v184_v32  ;;  %2301 = vmatpush3.bf16.msra.mxu0 %v2564_v12  ;;  %v156_v39 = vadd.f32 %v2610_v21, %v155_v37  ;;  %v176_v48 = vadd.f32 %v2610_v21, %v175_v38 }
  0xe2   :  { %2283 = vmatpush3.bf16.msra.mxu1 %v2620_v31  ;;  %2094 = vmatprep.mubr.msk.f32.mxu1 %vm2467_vm1, %v2468_v18  ;;  %v187_v43 = vmax.f32 %v161_v42, 0.0  ;;  %v191_v51 = vmax.f32 %v181_v50, 0.0 }
  0xe3   :  { %2284 = vmatprep.subr.bf16.mxu1 %v2466_v11  ;;  %2302 = vmatprep.subr.bf16.mxu0 %v2466_v11  ;;  %v186_v41 = vmax.f32 %v156_v39, 0.0  ;;  %v190_v49 = vmax.f32 %v176_v48, 0.0 }
  0xe4   :  { %2127 = vmatprep.mubr.msk.f32.mxu0 %vm2467_vm1, %v2468_v18 }
  0xe5   :  { %2304 = vmatpush3.bf16.msra.mxu0 %v2589_v17 }
  0xe6   :  { %2286 = vmatpush3.bf16.msra.mxu1 %v2633_v40  ;;  %2311 = vmatprep.subr.bf16.mxu0 %v2466_v11 }
  0xe7   :  { %2293 = vmatprep.subr.bf16.mxu1 %v2466_v11 }
  0xe8   :  { %2128 = vmatmul.mubr.msk.f32.vlgmr.msra.gmra.mrb[6].mxu0 %vm203_vm2, %v186_v41 }
  0xe9   :  { %2095 = vmatmul.mubr.f32.vlgmr.msra.gmra.mrb[6].mxu1 %v2468_v18  ;;  %2313 = vmatpush3.bf16.msra.mxu0 %v2564_v12 }
  0xea   :  { %2314 = vmatprep.subr.bf16.mxu0 %v2466_v11  ;;  %2149 = vmatprep.mubr.msk.f32.mxu0 %vm2467_vm1, %v2468_v18 }
  0xeb   :  { %2295 = vmatpush3.bf16.msra.mxu1 %v2620_v31  ;;  %2116 = vmatprep.mubr.msk.f32.mxu1 %vm2467_vm1, %v2468_v18 }
  0xec   :  { %2296 = vmatprep.subr.bf16.mxu1 %v2466_v11 }
  0xed   :  { %2316 = vmatpush3.bf16.msra.mxu0 %v2589_v17 }
  0xee   :  { %2323 = vmatprep.subr.bf16.mxu0 %v2466_v11 }
  0xef   :  { %2298 = vmatpush3.bf16.msra.mxu1 %v2633_v40 }
  0xf0   :  { %2150 = vmatmul.mubr.msk.f32.vlgmr.msra.gmra.mrb[8].mxu0 %vm203_vm2, %v187_v43  ;;  %2305 = vmatprep.subr.bf16.mxu1 %v2466_v11 }
  0xf1   :  { %2325 = vmatpush3.bf16.msra.mxu0 %v2564_v12  ;;  %2171 = vmatprep.mubr.msk.f32.mxu0 %vm2467_vm1, %v2468_v18 }
  0xf2   :  { %2326 = vmatprep.subr.bf16.mxu0 %v2466_v11 }
  0xf5   :  { %2328 = vmatpush3.bf16.msra.mxu0 %v2589_v17 }
  0xf6   :  { %2335 = vmatprep.subr.bf16.mxu0 %v2466_v11 }
  0xf8   :  { %2172 = vmatmul.mubr.msk.f32.vlgmr.msra.gmra.mrb[10].mxu0 %vm203_vm2, %v188_v45 }
  0xf9   :  { %2337 = vmatpush3.bf16.msra.mxu0 %v2564_v12  ;;  %2193 = vmatprep.mubr.msk.f32.mxu0 %vm2467_vm1, %v2468_v18 }
  0xfa   :  { %2338 = vmatprep.subr.bf16.mxu0 %v2466_v11 }
  0xfd   :  { %2340 = vmatpush3.bf16.msra.mxu0 %v2589_v17 }
  0xfe   :  { %2347 = vmatprep.subr.bf16.mxu0 %v2466_v11 }
 0x100   :  { %2194 = vmatmul.mubr.msk.f32.vlgmr.msra.gmra.mrb[12].mxu0 %vm203_vm2, %v189_v47 }
 0x101   :  { %2349 = vmatpush3.bf16.msra.mxu0 %v2564_v12  ;;  %2215 = vmatprep.mubr.msk.f32.mxu0 %vm2467_vm1, %v2468_v18 }
 0x102   :  { %2350 = vmatprep.subr.bf16.mxu0 %v2466_v11 }
 0x105   :  { %2352 = vmatpush3.bf16.msra.mxu0 %v2589_v17 }
 0x106   :  { %2359 = vmatprep.subr.bf16.mxu0 %v2466_v11 }
 0x108   :  { %2216 = vmatmul.mubr.msk.f32.vlgmr.msra.gmra.mrb[14].mxu0 %vm203_vm2, %v190_v49 }
 0x109   :  { %2361 = vmatpush3.bf16.msra.mxu0 %v2564_v12  ;;  %2237 = vmatprep.mubr.msk.f32.mxu0 %vm2467_vm1, %v2468_v18 }
 0x10a   :  { %2362 = vmatprep.subr.bf16.mxu0 %v2466_v11 }
 0x10d   :  { %2364 = vmatpush3.bf16.msra.mxu0 %v2589_v17 }
 0x110   :  { %2238 = vmatmul.mubr.msk.f32.vlgmr.msra.gmra.mrb[16].mxu0 %vm203_vm2, %v191_v51 }
 0x1b3   :  { %v2692_v52 = vpop.f32.mrb[4].mxu0 }
 0x1b4   :  { %v273_v53 = vpop.f32.mrb[4].mxu1  ;;  %v2107_v54 = vpop.f32.mrb[5].mxu0  ;;  %v557_v43 = vadd.f32 %v2692_v52, %v2717_v19 }
 0x1b5   :  { %v2085_v55 = vpop.f32.mrb[5].mxu1  ;;  %v372_v20 = vadd.f32 %v2717_v19, %v273_v53 }
 0x1bb   :  { %v2696_v57 = vpop.f32.mrb[6].mxu0 }
 0x1bc   :  { %v346_v58 = vpop.f32.mrb[6].mxu1  ;;  %v2129_v59 = vpop.f32.mrb[7].mxu0 }
 0x1bd   :  { %v350_v60 = vadd.f32 %v346_v58, %v273_v53  ;;  %v381_v61 = vadd.f32 %v2694_v56, %v346_v58  ;;  %v2096_v62 = vpop.f32.mrb[7].mxu1 }
 0x1bf   :  { %383 = vrot.lane.b32.xlu0 %v381_v61, %s2469_s27  ;;  %v357_v10 = vadd.f32 %v2713_v9, %v350_v60 }
 0x1c1   :  { %v1924_v12 = vmul.f32 -1.442695, %v357_v10 }
 0x1c3   :  { %v2700_v63 = vpop.f32.mrb[8].mxu0  ;;  %2386 = vpow2.f32 %v1924_v12 }
 0x1c4   :  { %v2151_v0 = vpop.f32.mrb[9].mxu0 }
 0x1cb   :  { %v2702_v1 = vpop.f32.mrb[10].mxu0 }
 0x1cc   :  { %v2173_v2 = vpop.f32.mrb[11].mxu0 }
 0x1cd   :  { %v2387_v13 = vpop.eup %2386 }
 0x1ce   :  { %v361_v14 = vadd.f32 1.0, %v2387_v13 }
 0x1d0   :  { %2388 = vrcp.f32 %v361_v14 }
 0x1d3   :  { %v2704_v3 = vpop.f32.mrb[12].mxu0 }
 0x1d4   :  { %v2195_v4 = vpop.f32.mrb[13].mxu0 }
 0x1da   :  { %v2389_v15 = vpop.eup %2388 }
 0x1db   :  { %v2706_v5 = vpop.f32.mrb[14].mxu0  ;;  %v393_v24 = vsub.f32 1.0, %v2389_v15  ;;  %v399_v26 = vmul.f32 0.0, %v2389_v15 }
 0x1dc   :  { %v2217_v6 = vpop.f32.mrb[15].mxu0 }
 0x1dd   :  { %v734_v6 = vadd.f32 %v2696_v57, %v2717_v19 }
 0x1e3   :  { %v2708_v7 = vpop.f32.mrb[16].mxu0 }
 0x1e4   :  { %v2239_v8 = vpop.f32.mrb[17].mxu0 }
 0x231   :  { %v384_v16 = vpop.permute.xlu0 %383 }
 0x232   :  { %v386_v17 = vmul.f32 %v2389_v15, %v384_v16 }
 0x234   :  { %388 = vrot.lane.b32.xlu1 %v386_v17, %s2469_s27 }
 0x2a6   :  { %v389_v21 = vpop.permute.xlu1 %388 }
 0x2a7   :  { %v391_v22 = vadd.f32 %v389_v21, %v372_v20 }
 0x2a9   :  { %2390 = vtanh.f32 %v391_v22 }
 0x2b3   :  { %v2391_v23 = vpop.eup %2390 }
 0x2b4   :  { %395 = vrot.lane.b32.xlu0 %v2391_v23, %s2470_s5 }
 0x326   :  { %v396_v25 = vpop.permute.xlu0 %395 }
 0x327   :  { %v398_v27 = vmul.f32 %v396_v25, %v393_v24 }
 0x329   :  { %v2721_v28 = vadd.f32 %v399_v26, %v398_v27 }
 0x32b   :  { %475 = vrot.lane.b32.xlu1 %v2721_v28, %s2470_s5 }
 0x39d   :  { %v476_v29 = vpop.permute.xlu1 %475 }
 0x39e   :  { %2117 = vmatmul.mubr.msk.f32.vlgmr.msra.gmra.mrb[8].mxu1 %vm203_vm2, %v476_v29 }
 0x39f   :  { %2307 = vmatpush3.bf16.msra.mxu1 %v2620_v31  ;;  %2138 = vmatprep.mubr.msk.f32.mxu1 %vm2467_vm1, %v2468_v18 }
 0x3a0   :  { %2308 = vmatprep.subr.bf16.mxu1 %v2466_v11 }
 0x3a3   :  { %2310 = vmatpush3.bf16.msra.mxu1 %v2633_v40 }
 0x3a4   :  { %2317 = vmatprep.subr.bf16.mxu1 %v2466_v11 }
 0x471   :  { %v545_v30 = vpop.f32.mrb[8].mxu1 }
 0x472   :  { %v549_v32 = vadd.f32 %v545_v30, %v2692_v52  ;;  %v558_v33 = vadd.f32 %v545_v30, %v2694_v56  ;;  %v2118_v34 = vpop.f32.mrb[9].mxu1 }
 0x474   :  { %560 = vrot.lane.b32.xlu0 %v558_v33, %s2469_s27  ;;  %v550_v35 = vadd.f32 %v2713_v9, %v549_v32  ;;  %v911_v33 = vadd.f32 %v2700_v63, %v2717_v19 }
 0x476   :  { %v1929_v36 = vmul.f32 -1.442695, %v550_v35 }
 0x478   :  { %2392 = vpow2.f32 %v1929_v36 }
 0x482   :  { %v2393_v37 = vpop.eup %2392 }
 0x483   :  { %v554_v38 = vadd.f32 1.0, %v2393_v37 }
 0x485   :  { %2394 = vrcp.f32 %v554_v38 }
 0x48f   :  { %v2395_v39 = vpop.eup %2394 }
 0x490   :  { %v570_v47 = vsub.f32 1.0, %v2395_v39  ;;  %v576_v49 = vmul.f32 %v2395_v39, %v2721_v28 }
 0x4e6   :  { %v561_v41 = vpop.permute.xlu0 %560 }
 0x4e7   :  { %v563_v42 = vmul.f32 %v2395_v39, %v561_v41 }
 0x4e9   :  { %565 = vrot.lane.b32.xlu1 %v563_v42, %s2469_s27 }
 0x55b   :  { %v566_v44 = vpop.permute.xlu1 %565 }
 0x55c   :  { %v568_v45 = vadd.f32 %v566_v44, %v557_v43 }
 0x55e   :  { %2396 = vtanh.f32 %v568_v45 }
 0x568   :  { %v2397_v46 = vpop.eup %2396 }
 0x569   :  { %572 = vrot.lane.b32.xlu0 %v2397_v46, %s2470_s5 }
 0x5db   :  { %v573_v48 = vpop.permute.xlu0 %572 }
 0x5dc   :  { %v575_v50 = vmul.f32 %v573_v48, %v570_v47 }
 0x5de   :  { %v2741_v51 = vadd.f32 %v576_v49, %v575_v50 }
 0x5e0   :  { %652 = vrot.lane.b32.xlu1 %v2741_v51, %s2470_s5 }
 0x652   :  { %v653_v53 = vpop.permute.xlu1 %652 }
 0x653   :  { %2139 = vmatmul.mubr.msk.f32.vlgmr.msra.gmra.mrb[10].mxu1 %vm203_vm2, %v653_v53 }
 0x654   :  { %2319 = vmatpush3.bf16.msra.mxu1 %v2620_v31  ;;  %2160 = vmatprep.mubr.msk.f32.mxu1 %vm2467_vm1, %v2468_v18 }
 0x655   :  { %2320 = vmatprep.subr.bf16.mxu1 %v2466_v11 }
 0x658   :  { %2322 = vmatpush3.bf16.msra.mxu1 %v2633_v40 }
 0x659   :  { %2329 = vmatprep.subr.bf16.mxu1 %v2466_v11 }
 0x726   :  { %v722_v52 = vpop.f32.mrb[10].mxu1 }
 0x727   :  { %v726_v54 = vadd.f32 %v722_v52, %v2696_v57  ;;  %v735_v55 = vadd.f32 %v722_v52, %v2694_v56  ;;  %v2140_v58 = vpop.f32.mrb[11].mxu1 }
 0x729   :  { %737 = vrot.lane.b32.xlu0 %v735_v55, %s2469_s27  ;;  %v727_v59 = vadd.f32 %v2713_v9, %v726_v54  ;;  %v1088_v55 = vadd.f32 %v2702_v1, %v2717_v19 }
 0x72b   :  { %v1932_v60 = vmul.f32 -1.442695, %v727_v59 }
 0x72d   :  { %2398 = vpow2.f32 %v1932_v60 }
 0x737   :  { %v2399_v61 = vpop.eup %2398 }
 0x738   :  { %v731_v62 = vadd.f32 1.0, %v2399_v61 }
 0x73a   :  { %2400 = vrcp.f32 %v731_v62 }
 0x744   :  { %v2401_v0 = vpop.eup %2400 }
 0x745   :  { %v747_v13 = vsub.f32 1.0, %v2401_v0  ;;  %v753_v15 = vmul.f32 %v2401_v0, %v2741_v51 }
 0x79b   :  { %v738_v2 = vpop.permute.xlu0 %737 }
 0x79c   :  { %v740_v4 = vmul.f32 %v2401_v0, %v738_v2 }
 0x79e   :  { %742 = vrot.lane.b32.xlu1 %v740_v4, %s2469_s27 }
 0x810   :  { %v743_v8 = vpop.permute.xlu1 %742 }
 0x811   :  { %v745_v10 = vadd.f32 %v743_v8, %v734_v6 }
 0x813   :  { %2402 = vtanh.f32 %v745_v10 }
 0x81d   :  { %v2403_v12 = vpop.eup %2402 }
 0x81e   :  { %749 = vrot.lane.b32.xlu0 %v2403_v12, %s2470_s5 }
 0x890   :  { %v750_v14 = vpop.permute.xlu0 %749 }
 0x891   :  { %v752_v16 = vmul.f32 %v750_v14, %v747_v13 }
 0x893   :  { %v2761_v17 = vadd.f32 %v753_v15, %v752_v16 }
 0x895   :  { %829 = vrot.lane.b32.xlu1 %v2761_v17, %s2470_s5 }
 0x907   :  { %v830_v20 = vpop.permute.xlu1 %829 }
 0x908   :  { %2161 = vmatmul.mubr.msk.f32.vlgmr.msra.gmra.mrb[12].mxu1 %vm203_vm2, %v830_v20 }
 0x909   :  { %2331 = vmatpush3.bf16.msra.mxu1 %v2620_v31  ;;  %2182 = vmatprep.mubr.msk.f32.mxu1 %vm2467_vm1, %v2468_v18 }
 0x90a   :  { %2332 = vmatprep.subr.bf16.mxu1 %v2466_v11 }
 0x90d   :  { %2334 = vmatpush3.bf16.msra.mxu1 %v2633_v40 }
 0x90e   :  { %2341 = vmatprep.subr.bf16.mxu1 %v2466_v11 }
 0x9db   :  { %v899_v57 = vpop.f32.mrb[12].mxu1 }
 0x9dc   :  { %v903_v21 = vadd.f32 %v899_v57, %v2700_v63  ;;  %v912_v22 = vadd.f32 %v899_v57, %v2694_v56  ;;  %v2162_v23 = vpop.f32.mrb[13].mxu1 }
 0x9de   :  { %914 = vrot.lane.b32.xlu0 %v912_v22, %s2469_s27  ;;  %v904_v24 = vadd.f32 %v2713_v9, %v903_v21  ;;  %v1265_v22 = vadd.f32 %v2704_v3, %v2717_v19 }
 0x9e0   :  { %v1935_v25 = vmul.f32 -1.442695, %v904_v24 }
 0x9e2   :  { %2404 = vpow2.f32 %v1935_v25 }
 0x9ec   :  { %v2405_v26 = vpop.eup %2404 }
 0x9ed   :  { %v908_v27 = vadd.f32 1.0, %v2405_v26 }
 0x9ef   :  { %2406 = vrcp.f32 %v908_v27 }
 0x9f9   :  { %v2407_v29 = vpop.eup %2406 }
 0x9fa   :  { %v924_v37 = vsub.f32 1.0, %v2407_v29  ;;  %v930_v39 = vmul.f32 %v2407_v29, %v2761_v17 }
 0xa50   :  { %v915_v30 = vpop.permute.xlu0 %914 }
 0xa51   :  { %v917_v32 = vmul.f32 %v2407_v29, %v915_v30 }
 0xa53   :  { %919 = vrot.lane.b32.xlu1 %v917_v32, %s2469_s27 }
 0xac5   :  { %v920_v34 = vpop.permute.xlu1 %919 }
 0xac6   :  { %v922_v35 = vadd.f32 %v920_v34, %v911_v33 }
 0xac8   :  { %2408 = vtanh.f32 %v922_v35 }
 0xad2   :  { %v2409_v36 = vpop.eup %2408 }
 0xad3   :  { %926 = vrot.lane.b32.xlu0 %v2409_v36, %s2470_s5 }
 0xb45   :  { %v927_v38 = vpop.permute.xlu0 %926 }
 0xb46   :  { %v929_v41 = vmul.f32 %v927_v38, %v924_v37 }
 0xb48   :  { %v2781_v42 = vadd.f32 %v930_v39, %v929_v41 }
 0xb4a   :  { %1006 = vrot.lane.b32.xlu1 %v2781_v42, %s2470_s5 }
 0xbbc   :  { %v1007_v43 = vpop.permute.xlu1 %1006 }
 0xbbd   :  { %2183 = vmatmul.mubr.msk.f32.vlgmr.msra.gmra.mrb[14].mxu1 %vm203_vm2, %v1007_v43 }
 0xbbe   :  { %2343 = vmatpush3.bf16.msra.mxu1 %v2620_v31  ;;  %2204 = vmatprep.mubr.msk.f32.mxu1 %vm2467_vm1, %v2468_v18 }
 0xbbf   :  { %2344 = vmatprep.subr.bf16.mxu1 %v2466_v11 }
 0xbc2   :  { %2346 = vmatpush3.bf16.msra.mxu1 %v2633_v40 }
 0xbc3   :  { %2353 = vmatprep.subr.bf16.mxu1 %v2466_v11 }
 0xc90   :  { %v1076_v63 = vpop.f32.mrb[14].mxu1 }
 0xc91   :  { %v1080_v44 = vadd.f32 %v1076_v63, %v2702_v1  ;;  %v1089_v45 = vadd.f32 %v1076_v63, %v2694_v56  ;;  %v2184_v46 = vpop.f32.mrb[15].mxu1 }
 0xc93   :  { %1091 = vrot.lane.b32.xlu0 %v1089_v45, %s2469_s27  ;;  %v1081_v47 = vadd.f32 %v2713_v9, %v1080_v44 }
 0xc95   :  { %v1938_v48 = vmul.f32 -1.442695, %v1081_v47 }
 0xc97   :  { %2410 = vpow2.f32 %v1938_v48 }
 0xca1   :  { %v2411_v49 = vpop.eup %2410 }
 0xca2   :  { %v1085_v50 = vadd.f32 1.0, %v2411_v49 }
 0xca4   :  { %2412 = vrcp.f32 %v1085_v50 }
 0xcae   :  { %v2413_v53 = vpop.eup %2412 }
 0xcaf   :  { %v1101_v61 = vsub.f32 1.0, %v2413_v53  ;;  %v1107_v0 = vmul.f32 %v2413_v53, %v2781_v42 }
 0xd05   :  { %v1092_v52 = vpop.permute.xlu0 %1091 }
 0xd06   :  { %v1094_v54 = vmul.f32 %v2413_v53, %v1092_v52 }
 0xd08   :  { %1096 = vrot.lane.b32.xlu1 %v1094_v54, %s2469_s27 }
 0xd7a   :  { %v1097_v58 = vpop.permute.xlu1 %1096 }
 0xd7b   :  { %v1099_v59 = vadd.f32 %v1097_v58, %v1088_v55 }
 0xd7d   :  { %2414 = vtanh.f32 %v1099_v59 }
 0xd87   :  { %v2415_v60 = vpop.eup %2414 }
 0xd88   :  { %1103 = vrot.lane.b32.xlu0 %v2415_v60, %s2470_s5 }
 0xdfa   :  { %v1104_v62 = vpop.permute.xlu0 %1103 }
 0xdfb   :  { %v1106_v2 = vmul.f32 %v1104_v62, %v1101_v61 }
 0xdfd   :  { %v2801_v4 = vadd.f32 %v1107_v0, %v1106_v2  ;;  %v1640_v2 = vmax.f32 %v2721_v28, 0.0 }
 0xdff   :  { %1183 = vrot.lane.b32.xlu1 %v2801_v4, %s2470_s5 }
 0xe71   :  { %v1184_v6 = vpop.permute.xlu1 %1183 }
 0xe72   :  { %2205 = vmatmul.mubr.msk.f32.vlgmr.msra.gmra.mrb[16].mxu1 %vm203_vm2, %v1184_v6  ;;  %v1648_v6 = vld [vmem:[%s3000_s8] sm:$0xff] }
 0xe73   :  { %2355 = vmatpush3.bf16.msra.mxu1 %v2620_v31  ;;  %2226 = vmatprep.mubr.msk.f32.mxu1 %vm2467_vm1, %v2468_v18 }
 0xe74   :  { %2356 = vmatprep.subr.bf16.mxu1 %v2466_v11 }
 0xe77   :  { %2358 = vmatpush3.bf16.msra.mxu1 %v2633_v40 }
 0xe78   :  { %2365 = vmatprep.subr.bf16.mxu1 %v2466_v11 }
 0xf45   :  { %v1253_v1 = vpop.f32.mrb[16].mxu1 }
 0xf46   :  { %v1257_v8 = vadd.f32 %v1253_v1, %v2704_v3  ;;  %v1266_v10 = vadd.f32 %v1253_v1, %v2694_v56  ;;  %v2206_v12 = vpop.f32.mrb[17].mxu1  ;;  %v1649_v1 = vld [vmem:[%s3000_s8 + $0x8] sm:$0xff] }
 0xf47   :  { %v2371_v28 = vpack.c.bf16 %v1649_v1, %v1648_v6 }
 0xf48   :  { %1268 = vrot.lane.b32.xlu0 %v1266_v10, %s2469_s27  ;;  %v1258_v13 = vadd.f32 %v2713_v9, %v1257_v8  ;;  %v1619_v10 = vadd.f32 %v2708_v7, %v2717_v19 }
 0xf49   :  { %2372 = vmatprep.subr.bf16.mxu0 %v2371_v28 }
 0xf4a   :  { %v1941_v14 = vmul.f32 -1.442695, %v1258_v13  ;;  %2374 = vmatpush3.bf16.msra.mxu0 %v2371_v28 }
 0xf4c   :  { %2416 = vpow2.f32 %v1941_v14 }
 0xf56   :  { %v2417_v15 = vpop.eup %2416 }
 0xf57   :  { %v1262_v16 = vadd.f32 1.0, %v2417_v15 }
 0xf59   :  { %2418 = vrcp.f32 %v1262_v16 }
 0xf63   :  { %v2419_v20 = vpop.eup %2418 }
 0xf64   :  { %v1278_v26 = vsub.f32 1.0, %v2419_v20  ;;  %v1284_v29 = vmul.f32 %v2419_v20, %v2801_v4 }
 0xfba   :  { %v1269_v57 = vpop.permute.xlu0 %1268 }
 0xfbb   :  { %v1271_v21 = vmul.f32 %v2419_v20, %v1269_v57  ;;  %v1641_v20 = vmax.f32 %v2741_v51, 0.0  ;;  %v1643_v57 = vmax.f32 %v2781_v42, 0.0 }
 0xfbd   :  { %1273 = vrot.lane.b32.xlu1 %v1271_v21, %s2469_s27 }
0x102f   :  { %v1274_v23 = vpop.permute.xlu1 %1273 }
0x1030   :  { %v1276_v24 = vadd.f32 %v1274_v23, %v1265_v22 }
0x1032   :  { %2420 = vtanh.f32 %v1276_v24 }
0x103c   :  { %v2421_v25 = vpop.eup %2420 }
0x103d   :  { %1280 = vrot.lane.b32.xlu0 %v2421_v25, %s2470_s5 }
0x10af   :  { %v1281_v27 = vpop.permute.xlu0 %1280 }
0x10b0   :  { %v1283_v30 = vmul.f32 %v1281_v27, %v1278_v26 }
0x10b2   :  { %v2821_v32 = vadd.f32 %v1284_v29, %v1283_v30 }
0x10b4   :  { %1360 = vrot.lane.b32.xlu1 %v2821_v32, %s2470_s5 }
0x1126   :  { %v1361_v33 = vpop.permute.xlu1 %1360 }
0x1127   :  { %2227 = vmatmul.mubr.msk.f32.vlgmr.msra.gmra.mrb[18].mxu1 %vm203_vm2, %v1361_v33  ;;  %v1948_v33 = vld [vmem:[%s3001_s9] ss:$0 sm:$0xff] }
0x1128   :  { %2367 = vmatpush3.bf16.msra.mxu1 %v2620_v31  ;;  %2248 = vmatprep.mubr.msk.f32.mxu1 %vm2467_vm1, %v2468_v18 }
0x1129   :  { %2368 = vmatprep.subr.bf16.mxu1 %v2466_v11 }
0x112c   :  { %2370 = vmatpush3.bf16.msra.mxu1 %v2633_v40  ;;  %v1442_v40 = vadd.f32 %v2706_v5, %v2717_v19 }
0x11fa   :  { %v1430_v3 = vpop.f32.mrb[18].mxu1 }
0x11fb   :  { %v1434_v34 = vadd.f32 %v1430_v3, %v2706_v5  ;;  %v1443_v35 = vadd.f32 %v1430_v3, %v2694_v56  ;;  %v2228_v36 = vpop.f32.mrb[19].mxu1 }
0x11fd   :  { %1445 = vrot.lane.b32.xlu0 %v1443_v35, %s2469_s27  ;;  %v1435_v37 = vadd.f32 %v2713_v9, %v1434_v34 }
0x11ff   :  { %v1944_v38 = vmul.f32 -1.442695, %v1435_v37 }
0x1201   :  { %2422 = vpow2.f32 %v1944_v38 }
0x120b   :  { %v2423_v31 = vpop.eup %2422 }
0x120c   :  { %v1439_v39 = vadd.f32 1.0, %v2423_v31 }
0x120e   :  { %2424 = vrcp.f32 %v1439_v39 }
0x1218   :  { %v2425_v18 = vpop.eup %2424 }
0x1219   :  { %v1455_v45 = vsub.f32 1.0, %v2425_v18  ;;  %v1461_v47 = vmul.f32 %v2425_v18, %v2821_v32 }
0x126f   :  { %v1446_v41 = vpop.permute.xlu0 %1445 }
0x1270   :  { %v1448_v11 = vmul.f32 %v2425_v18, %v1446_v41 }
0x1272   :  { %1450 = vrot.lane.b32.xlu1 %v1448_v11, %s2469_s27 }
0x12e4   :  { %v1451_v43 = vpop.permute.xlu1 %1450 }
0x12e5   :  { %v1453_v63 = vadd.f32 %v1451_v43, %v1442_v40 }
0x12e7   :  { %2426 = vtanh.f32 %v1453_v63 }
0x12f1   :  { %v2427_v44 = vpop.eup %2426 }
0x12f2   :  { %1457 = vrot.lane.b32.xlu0 %v2427_v44, %s2470_s5 }
0x1364   :  { %v1458_v46 = vpop.permute.xlu0 %1457 }
0x1365   :  { %v1460_v48 = vmul.f32 %v1458_v46, %v1455_v45 }
0x1367   :  { %v1462_v49 = vadd.f32 %v1461_v47, %v1460_v48 }
0x1369   :  { %1537 = vrot.lane.b32.xlu1 %v1462_v49, %s2470_s5  ;;  %v1646_v8 = vmax.f32 %v1462_v49, 0.0 }
0x13db   :  { %v1538_v50 = vpop.permute.xlu1 %1537 }
0x13dc   :  { %2249 = vmatmul.mubr.msk.f32.vlgmr.msra.gmra.mrb[20].mxu1 %vm203_vm2, %v1538_v50 }
0x14af   :  { %v1607_v53 = vpop.f32.mrb[20].mxu1 }
0x14b0   :  { %v1611_v5 = vadd.f32 %v1607_v53, %v2708_v7  ;;  %v1620_v52 = vadd.f32 %v1607_v53, %v2694_v56  ;;  %v2250_v54 = vpop.f32.mrb[21].mxu1  ;;  %v1642_v56 = vmax.f32 %v2761_v17, 0.0  ;;  %v1650_v17 = vld [vmem:[%s3000_s8 + $0x10] sm:$0xff]  ;;  %v1645_v7 = vmax.f32 %v2821_v32, 0.0 }
0x14b2   :  { %1622 = vrot.lane.b32.xlu0 %v1620_v52, %s2469_s27  ;;  %v1612_v55 = vadd.f32 %v2713_v9, %v1611_v5  ;;  %v1644_v9 = vmax.f32 %v2801_v4, 0.0  ;;  %v1651_v4 = vld [vmem:[%s3000_s8 + $0x18] sm:$0xff] }
0x14b3   :  { %v2375_v12 = vpack.c.bf16 %v1651_v4, %v1650_v17 }
0x14b4   :  { %v1947_v58 = vmul.f32 -1.442695, %v1612_v55 }
0x14b5   :  { %2376 = vmatprep.subr.bf16.mxu0 %v2375_v12 }
0x14b6   :  { %2428 = vpow2.f32 %v1947_v58  ;;  %2378 = vmatpush3.bf16.msra.mxu0 %v2375_v12 }
0x14c0   :  { %v2429_v59 = vpop.eup %2428 }
0x14c1   :  { %v1616_v60 = vadd.f32 1.0, %v2429_v59 }
0x14c3   :  { %2430 = vrcp.f32 %v1616_v60 }
0x14cd   :  { %v2431_v61 = vpop.eup %2430 }
0x14ce   :  { %v1632_v19 = vsub.f32 1.0, %v2431_v61  ;;  %v1638_v23 = vmul.f32 %v2431_v61, %v1462_v49 }
0x1524   :  { %v1623_v62 = vpop.permute.xlu0 %1622 }
0x1525   :  { %v1625_v0 = vmul.f32 %v2431_v61, %v1623_v62 }
0x1527   :  { %1627 = vrot.lane.b32.xlu1 %v1625_v0, %s2469_s27 }
0x152b   :  { %1667 = vrot.lane.b32.xlu1 %v1640_v2, %s2470_s5 }
0x152f   :  { %1671 = vrot.lane.b32.xlu1 %v1642_v56, %s2470_s5 }
0x1533   :  { %1675 = vrot.lane.b32.xlu1 %v1644_v9, %s2470_s5 }
0x1537   :  { %1679 = vrot.lane.b32.xlu1 %v1646_v8, %s2470_s5 }
0x1599   :  { %v1628_v13 = vpop.permute.xlu1 %1627 }
0x159a   :  { %v1630_v14 = vadd.f32 %v1628_v13, %v1619_v10 }
0x159c   :  { %2432 = vtanh.f32 %v1630_v14 }
0x159d   :  { %v1668_v15 = vpop.permute.xlu1 %1667 }
0x159e   :  { %2259 = vmatprep.mubr.msk.f32.mxu0 %vm203_vm2, %v1668_v15 }
0x15a1   :  { %v1672_v22 = vpop.permute.xlu1 %1671 }
0x15a5   :  { %v1676_v42 = vpop.permute.xlu1 %1675 }
0x15a6   :  { %v2433_v16 = vpop.eup %2432 }
0x15a7   :  { %1634 = vrot.lane.b32.xlu0 %v2433_v16, %s2470_s5 }
0x15a9   :  { %v1680_v30 = vpop.permute.xlu1 %1679 }
0x15ab   :  { %1669 = vrot.lane.b32.xlu0 %v1641_v20, %s2470_s5 }
0x15af   :  { %1673 = vrot.lane.b32.xlu0 %v1643_v57, %s2470_s5 }
0x15b3   :  { %1677 = vrot.lane.b32.xlu0 %v1645_v7, %s2470_s5 }
0x1619   :  { %v1635_v21 = vpop.permute.xlu0 %1634 }
0x161a   :  { %v1637_v24 = vmul.f32 %v1635_v21, %v1632_v19 }
0x161c   :  { %v2876_v25 = vadd.f32 %v1638_v23, %v1637_v24 }
0x161d   :  { %v1670_v26 = vpop.permute.xlu0 %1669 }
0x161e   :  { %2260 = vmatmul.mubr.msk.f32.vlgmr.msra.gmra.mrb[18].mxu0 %vm203_vm2, %v1670_v26  ;;  %v1647_v51 = vmax.f32 %v2876_v25, 0.0 }
0x161f   :  { %2262 = vmatprep.mubr.msk.f32.mxu0 %vm203_vm2, %v1672_v22 }
0x1620   :  { %1681 = vrot.lane.b32.xlu0 %v1647_v51, %s2470_s5 }
0x1621   :  { %v1674_v27 = vpop.permute.xlu0 %1673 }
0x1622   :  { %2263 = vmatmul.mubr.msk.f32.gmra.mrb[20].mxu0 %vm203_vm2, %v1674_v27 }
0x1623   :  { %2265 = vmatprep.mubr.msk.f32.mxu0 %vm203_vm2, %v1676_v42 }
0x1625   :  { %v1678_v29 = vpop.permute.xlu0 %1677 }
0x1626   :  { %2266 = vmatmul.mubr.msk.f32.gmra.mrb[22].mxu0 %vm203_vm2, %v1678_v29 }
0x1627   :  { %2268 = vmatprep.mubr.msk.f32.mxu0 %vm203_vm2, %v1680_v30 }
0x1692   :  { %v1682_v32 = vpop.permute.xlu0 %1681 }
0x1693   :  { %2269 = vmatmul.mubr.msk.f32.gmra.mrb[24].mxu0 %vm203_vm2, %v1682_v32 }
0x16f1   :  { %v2261_v3 = vpop.f32.mrb[18].mxu0 }
0x16f2   :  { %v2890_v34 = vadd.f32 %v2261_v3, %v1948_v33  ;;  %v1765_v35 = vpop.f32.mrb[19].mxu0 }
0x16f3   :  { %v2892_v36 = vadd.f32 %v1948_v33, %v1765_v35 }
0x16f4   :  { %1806 = vmax.xlane.f32.xlu0 %v2890_v34 }
0x16f5   :  { %1804 = vmax.xlane.f32.xlu1 %v2892_v36  ;;  %v2264_v37 = vpop.f32.mrb[20].mxu0 }
0x16f6   :  { %v2896_v38 = vadd.f32 %v2264_v37, %v1948_v33  ;;  %v1775_v31 = vpop.f32.mrb[21].mxu0 }
0x16f7   :  { %v2898_v39 = vadd.f32 %v1948_v33, %v1775_v31 }
0x16f9   :  { %1810 = vmax.xlane.f32.xlu1 %v2896_v38  ;;  %1808 = vmax.xlane.f32.xlu0 %v2898_v39  ;;  %v2267_v18 = vpop.f32.mrb[22].mxu0 }
0x16fa   :  { %v2902_v41 = vadd.f32 %v2267_v18, %v1948_v33  ;;  %v1785_v11 = vpop.f32.mrb[23].mxu0 }
0x16fb   :  { %v2904_v40 = vadd.f32 %v1948_v33, %v1785_v11 }
0x16fd   :  { %1814 = vmax.xlane.f32.xlu1 %v2902_v41  ;;  %1812 = vmax.xlane.f32.xlu0 %v2904_v40 }
0x1766   :  { %v2270_v43 = vpop.f32.mrb[24].mxu0 }
0x1767   :  { %v2908_v63 = vadd.f32 %v2270_v43, %v1948_v33  ;;  %v1795_v44 = vpop.f32.mrb[25].mxu0 }
0x1768   :  { %v2910_v45 = vadd.f32 %v1948_v33, %v1795_v44 }
0x1769   :  { %1818 = vmax.xlane.f32.xlu1 %v2908_v63 }
0x176a   :  { %1816 = vmax.xlane.f32.xlu0 %v2910_v45 }
0x1781   :  { %v2914_v46 = vpop.xlane.xlu0 %1806 }
0x1782   :  { %v1821_v47 = vsub.f32 %v2890_v34, %v2914_v46  ;;  %v2918_v48 = vpop.xlane.xlu1 %1804 }
0x1783   :  { %v1820_v49 = vsub.f32 %v2892_v36, %v2918_v48 }
0x1784   :  { %v1830_v50 = vmul.f32 1.442695, %v1821_v47 }
0x1785   :  { %v1828_v53 = vmul.f32 1.442695, %v1820_v49 }
0x1786   :  { %2434 = vpow2.f32 %v1830_v50  ;;  %v2922_v5 = vpop.xlane.xlu0 %1808  ;;  %v2924_v52 = vpop.xlane.xlu1 %1810 }
0x1787   :  { %2436 = vpow2.f32 %v1828_v53  ;;  %v1822_v54 = vsub.f32 %v2898_v39, %v2922_v5  ;;  %v1823_v55 = vsub.f32 %v2896_v38, %v2924_v52 }
0x1789   :  { %v1832_v58 = vmul.f32 1.442695, %v1822_v54  ;;  %v1834_v59 = vmul.f32 1.442695, %v1823_v55 }
0x178a   :  { %v2930_v60 = vpop.xlane.xlu0 %1812  ;;  %v2932_v61 = vpop.xlane.xlu1 %1814 }
0x178b   :  { %2438 = vpow2.f32 %v1832_v58  ;;  %v1824_v62 = vsub.f32 %v2904_v40, %v2930_v60  ;;  %v1825_v0 = vsub.f32 %v2902_v41, %v2932_v61 }
0x178c   :  { %2440 = vpow2.f32 %v1834_v59 }
0x178d   :  { %v1836_v2 = vmul.f32 1.442695, %v1824_v62  ;;  %v1838_v56 = vmul.f32 1.442695, %v1825_v0 }
0x178f   :  { %2442 = vpow2.f32 %v1836_v2 }
0x1790   :  { %v2435_v9 = vpop.eup %2434  ;;  %2444 = vpow2.f32 %v1838_v56 }
0x1791   :  { %v2437_v6 = vpop.eup %2436  ;;  %1846 = vadd.xlane.f32.xlu1 %v2435_v9 }
0x1792   :  { %1844 = vadd.xlane.f32.xlu0 %v2437_v6 }
0x1795   :  { %v2439_v1 = vpop.eup %2438 }
0x1796   :  { %v2441_v8 = vpop.eup %2440  ;;  %1848 = vadd.xlane.f32.xlu0 %v2439_v1 }
0x1797   :  { %1850 = vadd.xlane.f32.xlu1 %v2441_v8 }
0x1799   :  { %v2443_v28 = vpop.eup %2442 }
0x179a   :  { %v2445_v17 = vpop.eup %2444  ;;  %1852 = vadd.xlane.f32.xlu0 %v2443_v28 }
0x179b   :  { %1854 = vadd.xlane.f32.xlu1 %v2445_v17 }
0x17f6   :  { %v2938_v4 = vpop.xlane.xlu1 %1818 }
0x17f7   :  { %v1827_v10 = vsub.f32 %v2908_v63, %v2938_v4  ;;  %v2942_v12 = vpop.xlane.xlu0 %1816 }
0x17f8   :  { %v1826_v13 = vsub.f32 %v2910_v45, %v2942_v12 }
0x17f9   :  { %v1842_v14 = vmul.f32 1.442695, %v1827_v10 }
0x17fa   :  { %v1840_v15 = vmul.f32 1.442695, %v1826_v13 }
0x17fb   :  { %2446 = vpow2.f32 %v1842_v14 }
0x17fc   :  { %2448 = vpow2.f32 %v1840_v15 }
0x1805   :  { %v2447_v16 = vpop.eup %2446 }
0x1806   :  { %v2449_v20 = vpop.eup %2448  ;;  %1858 = vadd.xlane.f32.xlu1 %v2447_v16 }
0x1807   :  { %1856 = vadd.xlane.f32.xlu0 %v2449_v20 }
0x181d   :  { %1901 = vrot.lane.b32.xlu0 %v2876_v25, %s2470_s5 }
0x181e   :  { %v1847_v57 = vpop.xlane.xlu1 %1846 }
0x181f   :  { %2450 = vlog2.f32 %v1847_v57  ;;  %v1845_v7 = vpop.xlane.xlu0 %1844 }
0x1820   :  { %2452 = vlog2.f32 %v1845_v7 }
0x1823   :  { %v1849_v19 = vpop.xlane.xlu0 %1848 }
0x1824   :  { %2454 = vlog2.f32 %v1849_v19  ;;  %v1851_v21 = vpop.xlane.xlu1 %1850 }
0x1825   :  { %2456 = vlog2.f32 %v1851_v21 }
0x1827   :  { %v1853_v22 = vpop.xlane.xlu0 %1852 }
0x1828   :  { %2458 = vlog2.f32 %v1853_v22  ;;  %v1855_v23 = vpop.xlane.xlu1 %1854 }
0x1829   :  { %v2451_v24 = vpop.eup %2450  ;;  %2460 = vlog2.f32 %v1855_v23 }
0x182a   :  { %v2453_v26 = vpop.eup %2452  ;;  %v1863_v51 = vmul.f32 0.6931472, %v2451_v24 }
0x182b   :  { %v1861_v42 = vmul.f32 0.6931472, %v2453_v26 }
0x182c   :  { %v1877_v27 = vadd.f32 %v1863_v51, %v2914_v46 }
0x182d   :  { %v1876_v25 = vadd.f32 %v1861_v42, %v2918_v48 }
0x182e   :  { %v2455_v29 = vpop.eup %2454  ;;  %v1885_v30 = vsub.f32 %v2890_v34, %v1877_v27 }
0x182f   :  { %v2457_v32 = vpop.eup %2456  ;;  %v1884_v33 = vsub.f32 %v2892_v36, %v1876_v25  ;;  %v1865_v3 = vmul.f32 0.6931472, %v2455_v29 }
0x1830   :  { %1893 = vst [vmem:[%s3002_s10 + $0x8] sm:$0xff] %v1885_v30  ;;  %v1867_v35 = vmul.f32 0.6931472, %v2457_v32 }
0x1831   :  { %1892 = vst [vmem:[%s3002_s10] sm:$0xff] %v1884_v33  ;;  %v1878_v37 = vadd.f32 %v1865_v3, %v2922_v5 }
0x1832   :  { %v2459_v31 = vpop.eup %2458  ;;  %v1879_v18 = vadd.f32 %v1867_v35, %v2924_v52 }
0x1833   :  { %v2461_v11 = vpop.eup %2460  ;;  %v1886_v34 = vsub.f32 %v2898_v39, %v1878_v37  ;;  %v1869_v43 = vmul.f32 0.6931472, %v2459_v31 }
0x1834   :  { %v1887_v36 = vsub.f32 %v2896_v38, %v1879_v18  ;;  %v1871_v44 = vmul.f32 0.6931472, %v2461_v11 }
0x1835   :  { %1894 = vst [vmem:[%s3002_s10 + $0x10] sm:$0xff] %v1886_v34  ;;  %v1880_v46 = vadd.f32 %v1869_v43, %v2930_v60 }
0x1836   :  { %1895 = vst [vmem:[%s3002_s10 + $0x18] sm:$0xff] %v1887_v36  ;;  %v1881_v47 = vadd.f32 %v1871_v44, %v2932_v61 }
0x1837   :  { %v1888_v48 = vsub.f32 %v2904_v40, %v1880_v46 }
0x1838   :  { %v1889_v39 = vsub.f32 %v2902_v41, %v1881_v47 }
0x1839   :  { %1896 = vst [vmem:[%s3002_s10 + $0x20] sm:$0xff] %v1888_v48 }
0x183a   :  { %1897 = vst [vmem:[%s3002_s10 + $0x28] sm:$0xff] %v1889_v39 }
0x1893   :  { %v1859_v38 = vpop.xlane.xlu1 %1858 }
0x1894   :  { %2462 = vlog2.f32 %v1859_v38  ;;  %v1857_v49 = vpop.xlane.xlu0 %1856 }
0x1895   :  { %2464 = vlog2.f32 %v1857_v49 }
0x1898   :  { %v1902_v50 = vpop.permute.xlu0 %1901 }
0x1899   :  { %1904 = vst.msk [vmem:[%s3003_s11] sm:$0xff] %vm203_vm2, %v1902_v50 }
0x189e   :  { %v2463_v40 = vpop.eup %2462 }
0x189f   :  { %v2465_v41 = vpop.eup %2464  ;;  %v1875_v53 = vmul.f32 0.6931472, %v2463_v40 }
0x18a0   :  { %v1873_v5 = vmul.f32 0.6931472, %v2465_v41 }
0x18a1   :  { %v1883_v52 = vadd.f32 %v1875_v53, %v2938_v4 }
0x18a2   :  { %v1882_v54 = vadd.f32 %v1873_v5, %v2942_v12 }
0x18a3   :  { %v1891_v55 = vsub.f32 %v2908_v63, %v1883_v52 }
0x18a4   :  { %v1890_v58 = vsub.f32 %v2910_v45, %v1882_v54 }
0x18a5   :  { %1899 = vst [vmem:[%s3002_s10 + $0x38] sm:$0xff] %v1891_v55 }
0x18a6   :  { %1898 = vst [vmem:[%s3002_s10 + $0x30] sm:$0xff] %v1890_v58 }

</bundles_post_ra>
